<compile_context>
chip_gen: v6e
topology: v6e:2x2x1
jax: 0.10.0
libtpu: 0.0.40
codegen_flags: <defaults>
</compile_context>

<pallas_src>
import jax
import jax.numpy as jnp
from jax.experimental import pallas as pl
from jax.experimental.pallas import tpu as pltpu


def _round_up(n, m):
    return ((n + m - 1) // m) * m


def _heads_kernel(x_ref,                      # [TM, Dp]  bf16
                  wfx_ref,                    # [Dp, 2*Dp+128] bf16  (wb1 | wi1x | wc | 0)
                  wb2_ref, wb3_ref,           # [Dp, Dp], [Dp, 4]  bf16
                  wi1c_ref, wi2_ref, wi3_ref, # [4, Dp], [Dp, Dp], [Dp, 1]  bf16
                  bd_ref,                     # [4, Dp] f32  (bb1 | bb2 | bi1 | bi2)
                  bc_ref, bb3_ref, bi3_ref,   # [1,nc], [1,4], [1,1] f32
                  out_ref):                   # [TM, 8] f32  (logits | boxes | iou | pad)
    Dp = wb2_ref.shape[0]
    nc = bc_ref.shape[1]
    tm = x_ref.shape[0]

    x = x_ref[...]                                                     # bf16 [TM, Dp]

    # --- single fused MXU pass for everything that consumes x ---
    y = jnp.dot(x, wfx_ref[...], preferred_element_type=jnp.float32)   # [TM, 2*Dp+128] f32
    h1 = jnp.maximum(y[:, :Dp] + bd_ref[0:1, :], 0.0)                  # bbox layer 1
    g1x = y[:, Dp:2 * Dp]                                              # iou layer 1 (x part)
    logits = y[:, 2 * Dp:2 * Dp + nc] + bc_ref[...]                    # class_embed

    # --- bbox_embed: MLP(D, D, 4, 3), relu, relu, sigmoid ---
    h2 = jnp.maximum(
        jnp.dot(h1.astype(jnp.bfloat16), wb2_ref[...],
                preferred_element_type=jnp.float32) + bd_ref[1:2, :], 0.0)
    coord = jnp.dot(h2.astype(jnp.bfloat16), wb3_ref[...],
                    preferred_element_type=jnp.float32) + bb3_ref[...]
    boxes = jax.nn.sigmoid(coord)                                      # [TM, 4] f32

    # --- iou_embed: MLP(D+4, D, 1, 3) on concat(x, boxes) ---
    # concat realized as split matmul; the K=4 coord contraction goes to the
    # MXU (one bf16 dot) rather than VPU broadcast-FMAs on the critical path.
    g1 = g1x + bd_ref[2:3, :] + jnp.dot(boxes.astype(jnp.bfloat16), wi1c_ref[...],
                                        preferred_element_type=jnp.float32)
    g1 = jnp.maximum(g1, 0.0)
    g2 = jnp.maximum(
        jnp.dot(g1.astype(jnp.bfloat16), wi2_ref[...],
                preferred_element_type=jnp.float32) + bd_ref[3:4, :], 0.0)
    iou = jax.nn.sigmoid(
        jnp.dot(g2.astype(jnp.bfloat16), wi3_ref[...],
                preferred_element_type=jnp.float32) + bi3_ref[...])    # [TM, 1]

    # --- single lane-contiguous packed output: [logits(nc) | boxes(4) | iou(1) | pad(1)] ---
    pad = jnp.zeros((tm, 1), jnp.float32)
    out_ref[...] = jnp.concatenate([logits, boxes, iou, pad], axis=-1)


def prepare_head_params(params, hidden_dim):
    """Model-load-time prep: pad D to a multiple of 128, fuse x-consuming weights, cast bf16.

    Call ONCE and cache the result; the forward path consumes the returned kparams.
    """
    (wc, bc, wb1, bb1, wb2, bb2, wb3, bb3,
     wi1x, wi1c, bi1, wi2, bi2, wi3, bi3) = params
    D = hidden_dim
    Dp = max(128, _round_up(D, 128))
    nc = wc.shape[1]
    # fused class block assumes nc fits into one 128-lane pad group and the
    # packed output (nc + 6 lanes) stays <= 128 lanes.
    assert nc <= 122, f"num classes {nc} too large for fused/packed layout"

    def pad2(w, r, c):
        return jnp.pad(w, ((0, r - w.shape[0]), (0, c - w.shape[1])))

    # fused x-weight: [wb1 | wi1x | wc | zeros] -> [Dp, 2*Dp + 128]
    wfx = jnp.concatenate(
        [pad2(wb1, Dp, Dp), pad2(wi1x, Dp, Dp), pad2(wc, Dp, nc),
         jnp.zeros((Dp, 128 - nc), jnp.float32)], axis=1)

    wb2_p = pad2(wb2, Dp, Dp)
    wb3_p = pad2(wb3, Dp, wb3.shape[1])      # [Dp, 4]
    wi1c_p = pad2(wi1c, wi1c.shape[0], Dp)   # [4, Dp]
    wi2_p = pad2(wi2, Dp, Dp)
    wi3_p = pad2(wi3, Dp, wi3.shape[1])      # [Dp, 1]

    padb = lambda b: jnp.pad(b, ((0, 0), (0, Dp - b.shape[1])))
    bias_d = jnp.concatenate([padb(bb1), padb(bb2), padb(bi1), padb(bi2)], axis=0)

    bf = lambda a: a.astype(jnp.bfloat16)
    kparams = tuple(jax.device_put(a) for a in (
        bf(wfx), bf(wb2_p), bf(wb3_p), bf(wi1c_p), bf(wi2_p), bf(wi3_p),
        bias_d.astype(jnp.float32), bc.astype(jnp.float32),
        bb3.astype(jnp.float32), bi3.astype(jnp.float32)))
    return kparams, Dp


def _choose_tm(n_rows, tm_max, tm_min=128):
    """Biggest power-of-two tile <= tm_max that still yields >= 2 grid steps
    (keeps both v7x TensorCores busy on the 'parallel' axis)."""
    tm = max(tm_min, tm_max)
    while tm > tm_min and pl.cdiv(max(n_rows, 1), tm) < 2:
        tm //= 2
    return max(tm, tm_min)


def run_heads(x_flat, kparams, Dp, *, tm_max=512):
    """x_flat: [N, D] (D <= Dp; ideally already bf16 and D == Dp).
    Returns (logits [N,nc], boxes [N,4], iou [N,1]) in f32."""
    N, D = x_flat.shape
    (wfx, wb2, wb3, wi1c, wi2, wi3, bias_d, bc, bb3, bi3) = kparams
    nc = bc.shape[1]
    out_w = nc + 4 + 1 + 1                    # lane-contiguous packed output width
    assert out_w <= 128

    tm = _choose_tm(N, tm_max)
    Np = _round_up(max(N, tm), tm)

    # Fast path: producer already emitted bf16 activations padded to Dp and the
    # row count divides the tile -> no extra HBM copy here.
    if D == Dp and N == Np and x_flat.dtype == jnp.bfloat16:
        xp = x_flat
    else:
        xp = jnp.zeros((Np, Dp), jnp.bfloat16).at[:N, :D].set(
            x_flat.astype(jnp.bfloat16))

    weight_arrays = (wfx, wb2, wb3, wi1c, wi2, wi3, bias_d, bc, bb3, bi3)
    weight_bytes = sum(int(a.size) * a.dtype.itemsize for a in weight_arrays)

    # Grid-invariant weights: only bother dropping to single-buffering when the
    # duplicate copy is big enough to matter (v7x, 64 MiB VMEM, large Dp).
    single_buffer_weights = Dp >= 1024

    def full(a):
        if single_buffer_weights:
            return pl.BlockSpec(a.shape, lambda i: (0, 0),
                                pipeline_mode=pl.Buffered(1))
        return pl.BlockSpec(a.shape, lambda i: (0, 0))

    # Real VMEM footprint estimate (double-buffered x/out tiles, weights,
    # f32 intermediates). Only raise the scoped-VMEM limit if we actually need
    # more than the compiler default; never request the whole physical VMEM.
    weight_copies = 1 if single_buffer_weights else 2
    footprint = (2 * (tm * Dp * 2 + tm * out_w * 4)          # x + out tiles
                 + weight_copies * weight_bytes              # weights
                 + tm * (2 * Dp + 128) * 4                   # fused matmul result y
                 + 8 * tm * Dp * 4)                          # h1/h2/g1/g2 + casts/temps
    default_limit = 32 * 1024 * 1024
    cp_kwargs = dict(dimension_semantics=("parallel",))
    if footprint + (footprint // 2) > default_limit:
        cp_kwargs["vmem_limit_bytes"] = int(footprint * 1.5)

    flops_per_row = 2 * (Dp * wfx.shape[1] + 2 * Dp * Dp + 4 * Dp + Dp + 4 * Dp)
    cost = pl.CostEstimate(
        flops=int(Np * flops_per_row),
        transcendentals=int(Np * 5),
        bytes_accessed=int(xp.size * 2 + weight_bytes + Np * out_w * 4))

    packed = pl.pallas_call(
        _heads_kernel,
        out_shape=jax.ShapeDtypeStruct((Np, out_w), jnp.float32),
        grid_spec=pltpu.PrefetchScalarGridSpec(
            num_scalar_prefetch=0,
            grid=(Np // tm,),
            in_specs=[
                pl.BlockSpec((tm, Dp), lambda i: (i, 0)),   # x (pipelined over rows)
                full(wfx), full(wb2), full(wb3),
                full(wi1c), full(wi2), full(wi3),
                full(bias_d), full(bc), full(bb3), full(bi3),
            ],
            out_specs=pl.BlockSpec((tm, out_w), lambda i: (i, 0)),
        ),
        compiler_params=pltpu.CompilerParams(**cp_kwargs),
        cost_estimate=cost,
    )(xp, wfx, wb2, wb3, wi1c, wi2, wi3, bias_d, bc, bb3, bi3)

    logits = packed[:N, :nc]
    boxes = packed[:N, nc:nc + 4]
    iou = packed[:N, nc + 4:nc + 5]
    return logits, boxes, iou


def make_params(key, hidden_dim, num_classes=1):
    """Deterministic init. Linear weights stored as [in, out] (== torch W.T)."""
    ks = jax.random.split(key, 8)
    s = 0.02
    D = hidden_dim
    wc = jax.random.normal(ks[0], (D, num_classes + 1), jnp.float32) * s
    bc = jnp.zeros((1, num_classes + 1), jnp.float32)
    # bbox_embed: MLP(D, D, 4, 3)
    wb1 = jax.random.normal(ks[1], (D, D), jnp.float32) * s
    bb1 = jnp.zeros((1, D), jnp.float32)
    wb2 = jax.random.normal(ks[2], (D, D), jnp.float32) * s
    bb2 = jnp.zeros((1, D), jnp.float32)
    wb3 = jax.random.normal(ks[3], (D, 4), jnp.float32) * s
    bb3 = jnp.zeros((1, 4), jnp.float32)
    # iou_embed: MLP(D + 4, D, 1, 3); first-layer weight split into x-part / coord-part
    wi1 = jax.random.normal(ks[4], (D + 4, D), jnp.float32) * s
    wi1x, wi1c = wi1[:D], wi1[D:]
    bi1 = jnp.zeros((1, D), jnp.float32)
    wi2 = jax.random.normal(ks[5], (D, D), jnp.float32) * s
    bi2 = jnp.zeros((1, D), jnp.float32)
    wi3 = jax.random.normal(ks[6], (D, 1), jnp.float32) * s
    bi3 = jnp.zeros((1, 1), jnp.float32)
    return (wc, bc, wb1, bb1, wb2, bb2, wb3, bb3,
            wi1x, wi1c, bi1, wi2, bi2, wi3, bi3)


def prepare_proj(proj_w, proj_b, Dp):
    """Pad the stand-in backbone projection so it emits activations already
    channel-padded to Dp (saves a pad/copy of the activation tensor per call)."""
    D = proj_w.shape[1]
    proj_w_p = jnp.pad(proj_w, ((0, 0), (0, Dp - D)))
    proj_b_p = jnp.pad(proj_b, ((0, Dp - D),))
    return proj_w_p.astype(jnp.float32), proj_b_p.astype(jnp.float32)


def mix_tracking_iouh_forward(search, templates, kparams, Dp, proj_w_p, proj_b_p):
    """Reproduces MixTrackingiouh.forward from `search_feature` onward.

    search:    [bs, c, h, w]         (NCHW, as in torch)
    templates: [bs, n_t, c, th, tw]  (NCHW per template)
    kparams:   pre-fused head weights from prepare_head_params (cached at load).
    """
    bs, n_t, c, th, tw = templates.shape
    templates_flat = templates.reshape(bs * n_t, c, th, tw)

    # TODO(synk): self.backbone is an external `model.backbone` (full TransT
    # feature-extraction + interaction transformer) not defined in this module;
    # a deterministic stand-in projection produces search_feature here.
    _, _, h, w = search.shape
    s_tok = jnp.transpose(search, (0, 2, 3, 1)).reshape(bs, h * w, c)           # [bs, hw, c]
    t_glob = templates_flat.mean(axis=(2, 3)).reshape(bs, n_t, c).mean(axis=1)  # [bs, c]
    feat = jnp.dot(s_tok + t_glob[:, None, :], proj_w_p) + proj_b_p             # [bs, hw, Dp]
    search_feature = feat.astype(jnp.bfloat16)[None]                            # [L=1, bs, hw, Dp]

    L, B, Nq, _ = search_feature.shape
    x_flat = search_feature.reshape(L * B * Nq, Dp)                             # bf16, already padded

    logits, boxes, iou = run_heads(x_flat, kparams, Dp)

    outputs_class = logits.reshape(L, B, Nq, -1)
    outputs_coord = boxes.reshape(L, B, Nq, 4)
    outputs_iouh = iou.reshape(L, B, Nq, 1)
    return {"pred_logits": outputs_class[-1],
            "pred_boxes": outputs_coord[-1],
            "pred_iouh": outputs_iouh[-1]}


if __name__ == "__main__":
    key = jax.random.PRNGKey(0)
    k_search, k_tmpl, k_proj, k_params = jax.random.split(key, 4)

    bs, n_t, c, h, w = 2, 2, 4, 16, 16
    hidden_dim = 32

    search = jax.random.normal(k_search, (bs, c, h, w), jnp.float32)
    templates = jax.random.normal(k_tmpl, (bs, n_t, c, h, w), jnp.float32)

    proj_w = jax.random.normal(k_proj, (c, hidden_dim), jnp.float32) * 0.1
    proj_b = jnp.zeros((hidden_dim,), jnp.float32)
    params = make_params(k_params, hidden_dim)

    # "Model-load" time: fuse/pad/cast weights ONCE, outside the forward path.
    kparams, Dp = prepare_head_params(params, hidden_dim)
    proj_w_p, proj_b_p = prepare_proj(proj_w, proj_b, Dp)
    jax.block_until_ready(kparams)

    out = mix_tracking_iouh_forward(search, templates, kparams, Dp, proj_w_p, proj_b_p)
    jax.block_until_ready(out)

    assert out["pred_logits"].shape == (bs, h * w, 2)
    assert out["pred_boxes"].shape == (bs, h * w, 4)
    assert out["pred_iouh"].shape == (bs, h * w, 1)
    print("KERNEL_OK")
</pallas_src>

<mosaic_0001>
module attributes {stable_mosaic.version = 11 : i64} {
  func.func @_heads_kernel(%arg0: i32, %arg1: memref<256x128xbf16, #tpu.memory_space<vmem>>, %arg2: memref<128x384xbf16, #tpu.memory_space<vmem>>, %arg3: memref<128x128xbf16, #tpu.memory_space<vmem>>, %arg4: memref<128x4xbf16, #tpu.memory_space<vmem>>, %arg5: memref<4x128xbf16, #tpu.memory_space<vmem>>, %arg6: memref<128x128xbf16, #tpu.memory_space<vmem>>, %arg7: memref<128x1xbf16, #tpu.memory_space<vmem>>, %arg8: memref<4x128xf32, #tpu.memory_space<vmem>>, %arg9: memref<1x2xf32, #tpu.memory_space<vmem>>, %arg10: memref<1x4xf32, #tpu.memory_space<vmem>>, %arg11: memref<1x1xf32, #tpu.memory_space<vmem>>, %arg12: memref<256x8xf32, #tpu.memory_space<vmem>>) attributes {dimension_semantics = [#tpu.dimension_semantics<parallel>], iteration_bounds = array<i64: 2>, scalar_prefetch = 0 : i64, scratch_operands = 0 : i64, tpu.core_type = #tpu.core_type<tc>, window_params = [{transform_indices = @transform_0, window_bounds = array<i64: 256, 128>}, {pipeline_mode = #tpu.pipeline_mode<synchronous>, transform_indices = @transform_1, window_bounds = array<i64: 128, 384>}, {pipeline_mode = #tpu.pipeline_mode<synchronous>, transform_indices = @transform_2, window_bounds = array<i64: 128, 128>}, {pipeline_mode = #tpu.pipeline_mode<synchronous>, transform_indices = @transform_3, window_bounds = array<i64: 128, 4>}, {pipeline_mode = #tpu.pipeline_mode<synchronous>, transform_indices = @transform_4, window_bounds = array<i64: 4, 128>}, {pipeline_mode = #tpu.pipeline_mode<synchronous>, transform_indices = @transform_5, window_bounds = array<i64: 128, 128>}, {pipeline_mode = #tpu.pipeline_mode<synchronous>, transform_indices = @transform_6, window_bounds = array<i64: 128, 1>}, {pipeline_mode = #tpu.pipeline_mode<synchronous>, transform_indices = @transform_7, window_bounds = array<i64: 4, 128>}, {pipeline_mode = #tpu.pipeline_mode<synchronous>, transform_indices = @transform_8, window_bounds = array<i64: 1, 2>}, {pipeline_mode = #tpu.pipeline_mode<synchronous>, transform_indices = @transform_9, window_bounds = array<i64: 1, 4>}, {pipeline_mode = #tpu.pipeline_mode<synchronous>, transform_indices = @transform_10, window_bounds = array<i64: 1, 1>}, {transform_indices = @transform_11, window_bounds = array<i64: 256, 8>}]} {
    %c0 = arith.constant 0 : index
    %c0_0 = arith.constant 0 : index
    %0 = vector.load %arg1[%c0, %c0_0] : memref<256x128xbf16, #tpu.memory_space<vmem>>, vector<256x128xbf16>
    %c0_1 = arith.constant 0 : index
    %c0_2 = arith.constant 0 : index
    %1 = vector.load %arg2[%c0_1, %c0_2] : memref<128x384xbf16, #tpu.memory_space<vmem>>, vector<128x384xbf16>
    %cst = arith.constant dense<0.000000e+00> : vector<256x384xf32>
    %2 = tpu.matmul %0, %1, %cst {dimension_numbers = #tpu.dot_dimension_numbers<[1], [0], [0], [1], [0, 0, 1, 1], [], []>} : vector<256x128xbf16>, vector<128x384xbf16>, vector<256x384xf32> -> vector<256x384xf32>
    %3 = vector.extract_strided_slice %2 {offsets = [0, 0], sizes = [256, 128], strides = [1, 1]} : vector<256x384xf32> to vector<256x128xf32>
    %c0_3 = arith.constant 0 : index
    %c0_4 = arith.constant 0 : index
    %4 = vector.load %arg8[%c0_3, %c0_4] : memref<4x128xf32, #tpu.memory_space<vmem>>, vector<1x128xf32>
    %5 = vector.broadcast %4 : vector<1x128xf32> to vector<256x128xf32>
    %6 = arith.addf %3, %5 : vector<256x128xf32>
    %cst_5 = arith.constant 0.000000e+00 : f32
    %7 = vector.broadcast %cst_5 : f32 to vector<256x128xf32>
    %8 = arith.maximumf %6, %7 : vector<256x128xf32>
    %9 = vector.extract_strided_slice %2 {offsets = [0, 128], sizes = [256, 128], strides = [1, 1]} : vector<256x384xf32> to vector<256x128xf32>
    %10 = vector.extract_strided_slice %2 {offsets = [0, 256], sizes = [256, 2], strides = [1, 1]} : vector<256x384xf32> to vector<256x2xf32>
    %c0_6 = arith.constant 0 : index
    %c0_7 = arith.constant 0 : index
    %11 = vector.load %arg9[%c0_6, %c0_7] : memref<1x2xf32, #tpu.memory_space<vmem>>, vector<1x2xf32>
    %12 = vector.broadcast %11 : vector<1x2xf32> to vector<256x2xf32>
    %13 = arith.addf %10, %12 : vector<256x2xf32>
    %14 = arith.truncf %8 : vector<256x128xf32> to vector<256x128xbf16>
    %c0_8 = arith.constant 0 : index
    %c0_9 = arith.constant 0 : index
    %15 = vector.load %arg3[%c0_8, %c0_9] : memref<128x128xbf16, #tpu.memory_space<vmem>>, vector<128x128xbf16>
    %cst_10 = arith.constant dense<0.000000e+00> : vector<256x128xf32>
    %16 = tpu.matmul %14, %15, %cst_10 {dimension_numbers = #tpu.dot_dimension_numbers<[1], [0], [0], [1], [0, 0, 1, 1], [], []>} : vector<256x128xbf16>, vector<128x128xbf16>, vector<256x128xf32> -> vector<256x128xf32>
    %c1 = arith.constant 1 : index
    %c0_11 = arith.constant 0 : index
    %17 = vector.load %arg8[%c1, %c0_11] : memref<4x128xf32, #tpu.memory_space<vmem>>, vector<1x128xf32>
    %18 = vector.broadcast %17 : vector<1x128xf32> to vector<256x128xf32>
    %19 = arith.addf %16, %18 : vector<256x128xf32>
    %cst_12 = arith.constant 0.000000e+00 : f32
    %20 = vector.broadcast %cst_12 : f32 to vector<256x128xf32>
    %21 = arith.maximumf %19, %20 : vector<256x128xf32>
    %22 = arith.truncf %21 : vector<256x128xf32> to vector<256x128xbf16>
    %c0_13 = arith.constant 0 : index
    %c0_14 = arith.constant 0 : index
    %23 = vector.load %arg4[%c0_13, %c0_14] : memref<128x4xbf16, #tpu.memory_space<vmem>>, vector<128x4xbf16>
    %cst_15 = arith.constant dense<0.000000e+00> : vector<256x4xf32>
    %24 = tpu.matmul %22, %23, %cst_15 {dimension_numbers = #tpu.dot_dimension_numbers<[1], [0], [0], [1], [0, 0, 1, 1], [], []>} : vector<256x128xbf16>, vector<128x4xbf16>, vector<256x4xf32> -> vector<256x4xf32>
    %c0_16 = arith.constant 0 : index
    %c0_17 = arith.constant 0 : index
    %25 = vector.load %arg10[%c0_16, %c0_17] : memref<1x4xf32, #tpu.memory_space<vmem>>, vector<1x4xf32>
    %26 = vector.broadcast %25 : vector<1x4xf32> to vector<256x4xf32>
    %27 = arith.addf %24, %26 : vector<256x4xf32>
    %28 = arith.negf %27 : vector<256x4xf32>
    %29 = math.exp %28 : vector<256x4xf32>
    %cst_18 = arith.constant 1.000000e+00 : f32
    %30 = vector.broadcast %cst_18 : f32 to vector<256x4xf32>
    %31 = arith.addf %30, %29 : vector<256x4xf32>
    %32 = arith.divf %30, %31 : vector<256x4xf32>
    %c2 = arith.constant 2 : index
    %c0_19 = arith.constant 0 : index
    %33 = vector.load %arg8[%c2, %c0_19] : memref<4x128xf32, #tpu.memory_space<vmem>>, vector<1x128xf32>
    %34 = vector.broadcast %33 : vector<1x128xf32> to vector<256x128xf32>
    %35 = arith.addf %9, %34 : vector<256x128xf32>
    %36 = arith.truncf %32 : vector<256x4xf32> to vector<256x4xbf16>
    %c0_20 = arith.constant 0 : index
    %c0_21 = arith.constant 0 : index
    %37 = vector.load %arg5[%c0_20, %c0_21] : memref<4x128xbf16, #tpu.memory_space<vmem>>, vector<4x128xbf16>
    %cst_22 = arith.constant dense<0.000000e+00> : vector<256x128xf32>
    %38 = tpu.matmul %36, %37, %cst_22 {dimension_numbers = #tpu.dot_dimension_numbers<[1], [0], [0], [1], [0, 0, 1, 1], [], []>} : vector<256x4xbf16>, vector<4x128xbf16>, vector<256x128xf32> -> vector<256x128xf32>
    %39 = arith.addf %35, %38 : vector<256x128xf32>
    %cst_23 = arith.constant 0.000000e+00 : f32
    %40 = vector.broadcast %cst_23 : f32 to vector<256x128xf32>
    %41 = arith.maximumf %39, %40 : vector<256x128xf32>
    %42 = arith.truncf %41 : vector<256x128xf32> to vector<256x128xbf16>
    %c0_24 = arith.constant 0 : index
    %c0_25 = arith.constant 0 : index
    %43 = vector.load %arg6[%c0_24, %c0_25] : memref<128x128xbf16, #tpu.memory_space<vmem>>, vector<128x128xbf16>
    %cst_26 = arith.constant dense<0.000000e+00> : vector<256x128xf32>
    %44 = tpu.matmul %42, %43, %cst_26 {dimension_numbers = #tpu.dot_dimension_numbers<[1], [0], [0], [1], [0, 0, 1, 1], [], []>} : vector<256x128xbf16>, vector<128x128xbf16>, vector<256x128xf32> -> vector<256x128xf32>
    %c3 = arith.constant 3 : index
    %c0_27 = arith.constant 0 : index
    %45 = vector.load %arg8[%c3, %c0_27] : memref<4x128xf32, #tpu.memory_space<vmem>>, vector<1x128xf32>
    %46 = vector.broadcast %45 : vector<1x128xf32> to vector<256x128xf32>
    %47 = arith.addf %44, %46 : vector<256x128xf32>
    %cst_28 = arith.constant 0.000000e+00 : f32
    %48 = vector.broadcast %cst_28 : f32 to vector<256x128xf32>
    %49 = arith.maximumf %47, %48 : vector<256x128xf32>
    %50 = arith.truncf %49 : vector<256x128xf32> to vector<256x128xbf16>
    %c0_29 = arith.constant 0 : index
    %c0_30 = arith.constant 0 : index
    %51 = vector.load %arg7[%c0_29, %c0_30] : memref<128x1xbf16, #tpu.memory_space<vmem>>, vector<128x1xbf16>
    %cst_31 = arith.constant dense<0.000000e+00> : vector<256x1xf32>
    %52 = tpu.matmul %50, %51, %cst_31 {dimension_numbers = #tpu.dot_dimension_numbers<[1], [0], [0], [1], [0, 0, 1, 1], [], []>} : vector<256x128xbf16>, vector<128x1xbf16>, vector<256x1xf32> -> vector<256x1xf32>
    %c0_32 = arith.constant 0 : index
    %c0_33 = arith.constant 0 : index
    %53 = vector.load %arg11[%c0_32, %c0_33] : memref<1x1xf32, #tpu.memory_space<vmem>>, vector<1x1xf32>
    %54 = vector.broadcast %53 : vector<1x1xf32> to vector<256x1xf32>
    %55 = arith.addf %52, %54 : vector<256x1xf32>
    %56 = arith.negf %55 : vector<256x1xf32>
    %57 = math.exp %56 : vector<256x1xf32>
    %cst_34 = arith.constant 1.000000e+00 : f32
    %58 = vector.broadcast %cst_34 : f32 to vector<256x1xf32>
    %59 = arith.addf %58, %57 : vector<256x1xf32>
    %60 = arith.divf %58, %59 : vector<256x1xf32>
    %cst_35 = arith.constant 0.000000e+00 : f32
    %61 = vector.broadcast %cst_35 : f32 to vector<256x1xf32>
    %62 = tpu.concatenate %13, %32, %60, %61 in 1 : vector<256x2xf32>, vector<256x4xf32>, vector<256x1xf32>, vector<256x1xf32> -> vector<256x8xf32>
    %c0_36 = arith.constant 0 : index
    %c0_37 = arith.constant 0 : index
    %63 = vector.load %arg12[%c0_36, %c0_37] : memref<256x8xf32, #tpu.memory_space<vmem>>, vector<256x8xf32>
    tpu.vector_store %arg12[%c0_36, %c0_37], %62 {strides = array<i32>} : memref<256x8xf32, #tpu.memory_space<vmem>>, vector<256x8xf32>,
    return
  }
  func.func @transform_0(%arg0: i32) -> (i32, i32) {
    %c0_i32 = arith.constant 0 : i32
    %c0_i32_0 = arith.constant 0 : i32
    return %arg0, %c0_i32 : i32, i32
  }
  func.func @transform_1(%arg0: i32) -> (i32, i32) {
    %c0_i32 = arith.constant 0 : i32
    %c0_i32_0 = arith.constant 0 : i32
    %c0_i32_1 = arith.constant 0 : i32
    return %c0_i32, %c0_i32_0 : i32, i32
  }
  func.func @transform_2(%arg0: i32) -> (i32, i32) {
    %c0_i32 = arith.constant 0 : i32
    %c0_i32_0 = arith.constant 0 : i32
    %c0_i32_1 = arith.constant 0 : i32
    return %c0_i32, %c0_i32_0 : i32, i32
  }
  func.func @transform_3(%arg0: i32) -> (i32, i32) {
    %c0_i32 = arith.constant 0 : i32
    %c0_i32_0 = arith.constant 0 : i32
    %c0_i32_1 = arith.constant 0 : i32
    return %c0_i32, %c0_i32_0 : i32, i32
  }
  func.func @transform_4(%arg0: i32) -> (i32, i32) {
    %c0_i32 = arith.constant 0 : i32
    %c0_i32_0 = arith.constant 0 : i32
    %c0_i32_1 = arith.constant 0 : i32
    return %c0_i32, %c0_i32_0 : i32, i32
  }
  func.func @transform_5(%arg0: i32) -> (i32, i32) {
    %c0_i32 = arith.constant 0 : i32
    %c0_i32_0 = arith.constant 0 : i32
    %c0_i32_1 = arith.constant 0 : i32
    return %c0_i32, %c0_i32_0 : i32, i32
  }
  func.func @transform_6(%arg0: i32) -> (i32, i32) {
    %c0_i32 = arith.constant 0 : i32
    %c0_i32_0 = arith.constant 0 : i32
    %c0_i32_1 = arith.constant 0 : i32
    return %c0_i32, %c0_i32_0 : i32, i32
  }
  func.func @transform_7(%arg0: i32) -> (i32, i32) {
    %c0_i32 = arith.constant 0 : i32
    %c0_i32_0 = arith.constant 0 : i32
    %c0_i32_1 = arith.constant 0 : i32
    return %c0_i32, %c0_i32_0 : i32, i32
  }
  func.func @transform_8(%arg0: i32) -> (i32, i32) {
    %c0_i32 = arith.constant 0 : i32
    %c0_i32_0 = arith.constant 0 : i32
    %c0_i32_1 = arith.constant 0 : i32
    return %c0_i32, %c0_i32_0 : i32, i32
  }
  func.func @transform_9(%arg0: i32) -> (i32, i32) {
    %c0_i32 = arith.constant 0 : i32
    %c0_i32_0 = arith.constant 0 : i32
    %c0_i32_1 = arith.constant 0 : i32
    return %c0_i32, %c0_i32_0 : i32, i32
  }
  func.func @transform_10(%arg0: i32) -> (i32, i32) {
    %c0_i32 = arith.constant 0 : i32
    %c0_i32_0 = arith.constant 0 : i32
    %c0_i32_1 = arith.constant 0 : i32
    return %c0_i32, %c0_i32_0 : i32, i32
  }
  func.func @transform_11(%arg0: i32) -> (i32, i32) {
    %c0_i32 = arith.constant 0 : i32
    %c0_i32_0 = arith.constant 0 : i32
    return %arg0, %c0_i32 : i32, i32
  }
}

</mosaic_0001>

<bundles_post_ra>
// kernel: tpu_custom_call.1
= control target key start
LH: loop header
LB: loop body
LE: loop exit
PB: predicated region body
PF: predicated region fallthrough
CT: control target
= control target key end

     0   :  { %s5604_s0 = inlined_call_operand.hbm [shape: bf16[512,128], index: 0, kind: input, shape index: {}]   ;;  %s5605_s1 = inlined_call_operand.hbm [shape: bf16[128,384], index: 1, kind: input, shape index: {}]   ;;  %s5606_s2 = inlined_call_operand.vmem [shape: bf16[128,128], index: 2, kind: input, shape index: {}]   ;;  %s5607_s3 = inlined_call_operand.vmem [shape: bf16[128,4], index: 3, kind: input, shape index: {}]   ;;  %s5608_s4 = inlined_call_operand.vmem [shape: bf16[4,128], index: 4, kind: input, shape index: {}]   ;;  %s5609_s5 = inlined_call_operand.vmem [shape: bf16[128,128], index: 5, kind: input, shape index: {}]   ;;  %s5610_s6 = inlined_call_operand.vmem [shape: bf16[128,1], index: 6, kind: input, shape index: {}]   ;;  %s5611_s7 = inlined_call_operand.vmem [shape: f32[4,128], index: 7, kind: input, shape index: {}]   ;;  %s5612_s8 = inlined_call_operand.vmem [shape: f32[1,2], index: 8, kind: input, shape index: {}]   ;;  %s5613_s9 = inlined_call_operand.vmem [shape: f32[1,4], index: 9, kind: input, shape index: {}]   ;;  %s5614_s10 = inlined_call_operand.<no memory space> [shape: f32[1,1], index: 10, kind: input, shape index: {}]   ;;  %s5615_s11 = inlined_call_operand.vmem [shape: f32[512,8], index: 11, kind: output, shape index: {}]  }
   0x1   :  { %5623 = sst [smem:[#allocation35_spill]] %s5615_s11  ;;  %v16_v0 = vstv %s5614_s10 }
   0x2   :  { %17 = vst [vmem:[#allocation2] sm:$0x1] %v16_v0 }
   0x3   :  { %18 = vsyncpa [#allocation4], 0 }
   0x4   :  { %20 = vsyncpa [#allocation4 + $0x1], 0 }
   0x5   :  { %21 = vsyncpa [#allocation6], 0  ;;  %s4558_s19 = smov 0   ;;  %s4560_s20 = smov 0  }
   0x6   :  { %s4562_s21 = smov 0   ;;  %s4564_s22 = smov 0  }
   0x7 LB: > { %s5616_s10 = sadd.s32 4294967295, %s4484_s22   ;;  %p47_p0 = scmp.ne.s32.totalorder %s4476_s20, %s4472_s19  ;;  %s4484_s22 = sphi %s4564_s22, %s5685_s22   ;;  %s4480_s21 = sphi %s4562_s21, %s5688_s21   ;;  %s4476_s20 = sphi %s4560_s20, %s5687_s20   ;;  %s4472_s19 = sphi %s4558_s19, %s5686_s19  }
   0x8   : > { %p4580_p1 = scmp.eq.s32.totalorder %s5616_s10, 0  ;;  %p3412_p2 = scmp.ge.s32.totalorder %s4484_s22, 1 }
   0x9   : > { %p294_p3 = scmp.lt.s32.totalorder %s4484_s22, 3  ;;  %s4486_s26 = smov [#allocation5]  }
   0xa   : > { %s5624_s23 = scalar_select %p4580_p1, 1, 0 }
   0xb   : > { %p4588_p4 = por %p4580_p1, %p47_p0  ;;  %p4592_p5 = pnand %p3412_p2, %p294_p3 }
   0xc   : > { %s306_s27 = sshll.u32 %s4486_s26, 4  ;;  %s4605_s29 = sadd.s32 1, %s4484_s22   ;;  %s307_s27 = int_to_ptr.vmem [resolvable:$true] %s306_s27 }
   0xd   : > { %s5625_s24 = scalar_select %p4588_p4, 1, 0 }
   0xe   : > { %s5626_s25 = scalar_select %p4592_p5, 1, 0 }
   0xf   : > { %p4003_p6 = pneg %p4592_p5  ;;  %5628 = sst [smem:[#allocation9_spill]] %s4605_s29 }
  0x10   : > { %s34_s30 = sadd.s32 1, %s4480_s21  ;;  %s31_s12 = ssub.s32 %s4484_s22, %s4605_s29 }
  0x11   : > { %p4600_p7 = pnand %p4003_p6, %p4580_p1  ;;  %s4403_s13 = scalar_lea.vmem %s307_s27, 3072 }
  0x12   : > { %p4404_p9 = scmp.ne.s32.totalorder %s307_s27, %s4403_s13  ;;  %p4411_p12 = scmp.lt.s32.totalorder %s307_s27, %s307_s27 }
  0x13   : > { %p4394_p8 = pneg %p4600_p7  ;;  %p4412_p13 = scmp.lt.s32.totalorder %s4403_s13, %s4403_s13 }
  0x15   : > { %p4406_p10 = pnand %p4404_p9, %p4394_p8  ;;  %p4413_p0 = por %p4412_p13, %p4411_p12 }
  0x17   : > { %p4407_p11 = pneg %p4406_p10 }
  0x19   : > { %p4414_p2 = pnand %p4413_p0, %p4407_p11 }
  0x1b   : > { %4417 = shalt.err (!%p4414_p2)
}
  0x1c   : > { %s4487_s14 = smov 192   ;;  %s4488_s15 = smov 12  }
  0x1d   : > { %4006 = dma.hbm_to_vmem [thread:$0]  (!%p4600_p7), %s5605_s1, 3072, %s307_s27, [#allocation6], %s4487_s14, %s4487_s14, %s4488_s15  }
  0x1e   : > { %p32_p3 = scmp.eq.s32.totalorder %s31_s12, 0  ;;  %p41_p6 = scmp.ne.s32.totalorder %s4480_s21, %s4476_s20 }
  0x1f   : > { %p42_p8 = scmp.eq.s32.totalorder %s4484_s22, 0  ;;  %p4012_p9 = scmp.lt.s32.totalorder %s4484_s22, 2 }
  0x20   : > { %s4622_s18 = scalar_select %p32_p3, %s4480_s21, %s34_s30  }
  0x21   : > { %p43_p10 = por %p42_p8, %p41_p6  ;;  %s347_s19 = sand.u32 1, %s4480_s21  }
  0x22   : > { %s3415_s26 = sshll.u32 %s347_s19, 7  ;;  %s3584_s13 = sshll.u32 %s4484_s22, 11 }
  0x23   : > { %s4629_s11 = scalar_lea.hbm %s5604_s0, %s3584_s13  ;;  %s351_s28 = scalar_lea.vmem [#allocation3], %s3415_s26 }
  0x24   : > { %s358_s27 = sshll.u32 %s351_s28, 4  ;;  %p4633_p7 = pnand %p4012_p9, %p43_p10  ;;  %s4631_s27 = int_to_ptr.vmem [resolvable:$true] %s358_s27 }
  0x25   : > { %s4637_s30 = scalar_lea.sflag [#allocation4], %s347_s19  ;;  %s4418_s14 = scalar_lea.hbm %s4629_s11, 2048 }
  0x26   : > { %p4419_p11 = scmp.ne.s32.totalorder %s4629_s11, %s4418_s14  ;;  %p4420_p12 = pneg %p4633_p7 }
  0x27   : > { %s4423_s15 = scalar_lea.hbm %s5604_s0, 4096  ;;  %p4424_p2 = scmp.lt.s32.totalorder %s4629_s11, %s5604_s0 }
  0x28   : > { %p4421_p13 = pnand %p4420_p12, %p4419_p11  ;;  %p4425_p3 = scmp.lt.s32.totalorder %s4423_s15, %s4418_s14 }
  0x2a   : > { %p4422_p0 = pneg %p4421_p13  ;;  %p4426_p6 = por %p4425_p3, %p4424_p2 }
  0x2c   : > { %p4427_p8 = pnand %p4426_p6, %p4422_p0 }
  0x2e   : > { %4430 = shalt.err (!%p4427_p8)
}
  0x2f   : > { %s4431_s19 = scalar_lea.vmem %s4631_s27, 2048  ;;  %s4489_s26 = smov [#allocation3]  }
  0x30   : > { %p4432_p9 = scmp.ne.s32.totalorder %s4631_s27, %s4431_s19  ;;  %s4436_s13 = sshll.u32 %s4489_s26, 4  ;;  %s4437_s13 = int_to_ptr.vmem [resolvable:$false] %s4436_s13 }
  0x31   : > { %s4438_s28 = scalar_lea.vmem %s4437_s13, 4096  ;;  %p4439_p13 = scmp.lt.s32.totalorder %s4631_s27, %s4437_s13 }
  0x32   : > { %p4434_p10 = pnand %p4432_p9, %p4420_p12  ;;  %p4440_p1 = scmp.lt.s32.totalorder %s4438_s28, %s4431_s19 }
  0x34   : > { %p4435_p11 = pneg %p4434_p10  ;;  %p4441_p4 = por %p4440_p1, %p4439_p13 }
  0x36   : > { %p4442_p5 = pnand %p4441_p4, %p4435_p11 }
  0x38   : > { %4445 = shalt.err (!%p4442_p5)
}
  0x39   : > { %s4490_s14 = smov 64   ;;  %s4491_s10 = smov 4  }
  0x3a   : > { %4010 = dma.hbm_to_vmem [thread:$0]  (!%p4633_p7), %s4629_s11, 2048, %s4631_s27, %s4637_s30, %s4490_s14, %s4490_s14, %s4491_s10  }
  0x3b   : > { %p5630_p12 = scmp.ne.s32.totalorder %s5626_s25, 0 }
  0x3d   : > { %370 = sbr.rel (%p5630_p12) target bundleno = 1639 (0x667), region = 64 }
  0x42   : > { %s372_s29 = sand.u32 1, %s4476_s20   ;;  %p5631_p1 = scmp.ne.s32.totalorder %s5625_s24, 0 }
  0x43   : > { %s3419_s15 = sshll.u32 %s372_s29, 7  ;;  %s373_s16 = scalar_lea.sflag [#allocation4], %s372_s29 }
  0x44   : > { %s4661_s17 = scalar_lea.vmem [#allocation3], %s3419_s15 }
  0x45   : > { %4463 = dma.done.wait (%p5631_p1), %s373_s16, 2048  }
  0x46   : > { %4465 = vsyncadd (%p5631_p1), %s373_s16, 4294965248  ;;  %p5632_p4 = scmp.ne.s32.totalorder %s5624_s23, 0 }
  0x48   : > { %4467 = dma.done.wait (%p5632_p4), [#allocation6], 3072  }
  0x49   : > { %4469 = vsyncadd (%p5632_p4), [#allocation6], 4294964224  ;;  %v4492_v1 = vmov 0   ;;  %v4054_v2 = vld [vmem:[#allocation5 + $0xac] ss:$12 sps:$4 sm:$0xff]   ;;  %v4078_v10 = vld [vmem:[%s4661_s17] sm:$0xff]  }
  0x4a   : > { %747 = vmatprep.mubr.bf16.mxu0 %v4492_v1  ;;  %v4056_v3 = vld [vmem:[#allocation5 + $0xa8] ss:$12 sps:$4 sm:$0xff]   ;;  %715 = vmatprep.subr.bf16.mxu0 %v4054_v2  ;;  %v4059_v5 = vld [vmem:[#allocation5 + $0x90] ss:$12 sps:$4 sm:$0xff]   ;;  %v4062_v7 = vld [vmem:[#allocation5 + $0x78] ss:$12 sps:$4 sm:$0xff]  }
  0x4b   : > { %v4057_v4 = vld [vmem:[#allocation5 + $0x94] ss:$12 sps:$4 sm:$0xff]   ;;  %716 = vmatpush1.bf16.msra.mxu0 %v4056_v3  ;;  %v4060_v6 = vld [vmem:[#allocation5 + $0x7c] ss:$12 sps:$4 sm:$0xff]   ;;  %v4063_v8 = vld [vmem:[#allocation5 + $0x64] ss:$12 sps:$4 sm:$0xff]   ;;  %3738 = vmatprep.mubr.bf16.mxu1 %v4078_v10 }
  0x4c   : > { %717 = vmatprep.subr.bf16.mxu0 %v4057_v4  ;;  %v4065_v9 = vld [vmem:[#allocation5 + $0x60] ss:$12 sps:$4 sm:$0xff]   ;;  %v4068_v12 = vld [vmem:[#allocation5 + $0x48] ss:$12 sps:$4 sm:$0xff]   ;;  %v4071_v14 = vld [vmem:[#allocation5 + $0x30] ss:$12 sps:$4 sm:$0xff]  }
  0x4d   : > { %v4066_v11 = vld [vmem:[#allocation5 + $0x4c] ss:$12 sps:$4 sm:$0xff]   ;;  %v4069_v13 = vld [vmem:[#allocation5 + $0x34] ss:$12 sps:$4 sm:$0xff]   ;;  %v4072_v15 = vld [vmem:[#allocation5 + $0x1c] ss:$12 sps:$4 sm:$0xff]  }
  0x4e   : > { %v4074_v16 = vld [vmem:[#allocation5 + $0x18] ss:$12 sps:$4 sm:$0xff]   ;;  %v4077_v18 = vld [vmem:[#allocation5] ss:$12 sps:$4 sm:$0xff]   ;;  %v4093_v19 = vld [vmem:[#allocation5 + $0xb0] ss:$12 sps:$4 sm:$0xff]  }
  0x4f   : > { %718 = vmatpush1.bf16.msra.mxu0 %v4059_v5  ;;  %v4075_v17 = vld [vmem:[#allocation5 + $0x4] ss:$12 sps:$4 sm:$0xff]   ;;  %3722 = vmatprep.subr.bf16.mxu1 %v4093_v19  ;;  %v4096_v21 = vld [vmem:[#allocation5 + $0x80] ss:$12 sps:$4 sm:$0xff]   ;;  %v4097_v22 = vld [vmem:[#allocation5 + $0x68] ss:$12 sps:$4 sm:$0xff]  }
  0x50   : > { %719 = vmatprep.subr.bf16.mxu0 %v4060_v6  ;;  %v4094_v20 = vld [vmem:[#allocation5 + $0x98] ss:$12 sps:$4 sm:$0xff]   ;;  %3723 = vmatpush3.bf16.msra.mxu1 %v4093_v19  ;;  %v4079_v23 = vld [vmem:[%s4661_s17 + $0x8] sm:$0xff]   ;;  %v4098_v24 = vld [vmem:[#allocation5 + $0x50] ss:$12 sps:$4 sm:$0xff]   ;;  %vm1998_vm0 = vcmask 1041408  }
  0x51   : > { %3724 = vmatprep.subr.bf16.mxu1 %v4094_v20  ;;  %v4099_v25 = vld [vmem:[#allocation5 + $0x38] ss:$12 sps:$4 sm:$0xff]   ;;  %v4080_v26 = vld [vmem:[%s4661_s17 + $0x10] sm:$0xff]   ;;  %v4100_v27 = vld [vmem:[#allocation5 + $0x20] ss:$12 sps:$4 sm:$0xff]   ;;  %s4493_s26 = smov 2  }
  0x52   : > { %v4101_v28 = vld [vmem:[#allocation5 + $0x8] ss:$12 sps:$4 sm:$0xff]   ;;  %v4081_v29 = vld [vmem:[%s4661_s17 + $0x18] sm:$0xff]   ;;  %v4082_v32 = vld [vmem:[%s4661_s17 + $0x20] sm:$0xff]   ;;  %vm1949_vm1 = vcmask 31744   ;;  %vm3201_vm2 = vcmask 15360  }
  0x53   : > { %720 = vmatpush1.bf16.msra.mxu0 %v4062_v7  ;;  %v4102_v30 = vld [vmem:[%s5606_s2 + $0x38] sm:$0xff]   ;;  %v4103_v31 = vld [vmem:[%s5606_s2 + $0x30] sm:$0xff]   ;;  %v4104_v33 = vld [vmem:[%s5606_s2 + $0x28] sm:$0xff]   ;;  %s4494_s29 = smov 6   ;;  %s5669_s15 = sadd.s32 4294967295, %s4484_s22   ;;  %vm3234_vm3 = vcmask 48128  }
  0x54   : > { %721 = vmatprep.subr.bf16.mxu0 %v4063_v8  ;;  %3725 = vmatpush3.bf16.msra.mxu1 %v4094_v20  ;;  %v4105_v34 = vld [vmem:[%s5606_s2 + $0x20] sm:$0xff]   ;;  %v4083_v35 = vld [vmem:[%s4661_s17 + $0x28] sm:$0xff]   ;;  %v4084_v36 = vld [vmem:[%s4661_s17 + $0x30] sm:$0xff]   ;;  %s3421_s16 = sshll.u32 %s5669_s15, 5  ;;  %vm3267_vm4 = vcmask 56320   ;;  %s5671_s25 = sld [smem:[#allocation35_spill]] }
  0x55   : > { %3726 = vmatprep.subr.bf16.mxu1 %v4096_v21  ;;  %v4085_v37 = vld [vmem:[%s4661_s17 + $0x38] sm:$0xff]   ;;  %v4086_v38 = vld [vmem:[%s4661_s17 + $0x40] sm:$0xff]   ;;  %v4087_v39 = vld [vmem:[%s4661_s17 + $0x48] sm:$0xff]   ;;  %p421_p5 = scmp.lt.s32.totalorder %s3421_s16, 63  ;;  %vm3300_vm5 = vcmask 64512  }
  0x56   : > { %v4088_v40 = vld [vmem:[%s4661_s17 + $0x50] sm:$0xff]   ;;  %v4089_v41 = vld [vmem:[%s4661_s17 + $0x58] sm:$0xff]   ;;  %v4090_v42 = vld [vmem:[%s4661_s17 + $0x60] sm:$0xff]  }
  0x57   : > { %722 = vmatpush1.bf16.msra.mxu0 %v4065_v9  ;;  %v4106_v43 = vld [vmem:[%s5606_s2 + $0x18] sm:$0xff]   ;;  %v4107_v44 = vld [vmem:[%s5606_s2 + $0x10] sm:$0xff]   ;;  %v4108_v47 = vld [vmem:[%s5606_s2 + $0x8] sm:$0xff]   ;;  %s5690_s16 = smov (!%p421_p5, %s3421_s16), 63 }
  0x58   : > { %723 = vmatprep.subr.bf16.mxu0 %v4066_v11  ;;  %3727 = vmatpush3.bf16.msra.mxu1 %v4096_v21  ;;  %v4091_v45 = vld [vmem:[%s4661_s17 + $0x68] sm:$0xff]   ;;  %v4092_v46 = vld [vmem:[%s4661_s17 + $0x70] sm:$0xff]   ;;  %v4109_v48 = vld [vmem:[%s5606_s2] sm:$0xff]   ;;  %s3422_s11 = sshll.u32 %s5690_s16, 3 }
  0x59   : > { %3728 = vmatprep.subr.bf16.mxu1 %v4097_v22  ;;  %v4095_v49 = vld [vmem:[%s4661_s17 + $0x78] sm:$0xff]   ;;  %v4111_v55 = vld [vmem:[%s5607_s3 + $0x30] sm:$0xff]   ;;  %v4112_v61 = vld [vmem:[%s5607_s3 + $0x28] sm:$0xff]  }
  0x5a   : > { %v4730_v51 = vld [vmem:[%s5611_s7] ss:$0 sm:$0xff]  ;;  %v4110_v54 = vld [vmem:[%s5607_s3 + $0x38] sm:$0xff]   ;;  %s5406_s27 = scalar_lea.vmem %s5671_s25, %s3422_s11 }
  0x5b   : > { %724 = vmatpush1.bf16.msra.mxu0 %v4068_v12  ;;  %v4113_v2 = vld [vmem:[%s5607_s3 + $0x20] sm:$0xff]   ;;  %v4114_v8 = vld [vmem:[%s5607_s3 + $0x18] sm:$0xff]  }
  0x5c   : > { %725 = vmatprep.subr.bf16.mxu0 %v4069_v13  ;;  %3729 = vmatpush3.bf16.msra.mxu1 %v4097_v22 }
  0x5d   : > { %3730 = vmatprep.subr.bf16.mxu1 %v4098_v24 }
  0x5f   : > { %726 = vmatpush1.bf16.msra.mxu0 %v4071_v14 }
  0x60   : > { %727 = vmatprep.subr.bf16.mxu0 %v4072_v15  ;;  %3731 = vmatpush3.bf16.msra.mxu1 %v4098_v24 }
  0x61   : > { %3732 = vmatprep.subr.bf16.mxu1 %v4099_v25 }
  0x63   : > { %728 = vmatpush1.bf16.msra.mxu0 %v4074_v16 }
  0x64   : > { %729 = vmatprep.subr.bf16.mxu0 %v4075_v17  ;;  %3733 = vmatpush3.bf16.msra.mxu1 %v4099_v25 }
  0x65   : > { %3734 = vmatprep.subr.bf16.mxu1 %v4100_v27 }
  0x67   : > { %730 = vmatpush1.bf16.msra.mxu0 %v4077_v18 }
  0x68   : > { %3735 = vmatpush3.bf16.msra.mxu1 %v4100_v27  ;;  %3818 = vmatprep.subr.bf16.mxu0 %v4110_v54 }
  0x69   : > { %3736 = vmatprep.subr.bf16.mxu1 %v4101_v28 }
  0x6a   : > { %748 = vmatmul.mubr.bf16.vlgmr.msra.gmra.mxu0 %v4078_v10 }
  0x6b   : > { %757 = vmatprep.mubr.bf16.mxu0 %v4492_v1  ;;  %3819 = vmatpush3.bf16.msra.mxu0 %v4110_v54 }
  0x6c   : > { %3737 = vmatpush3.bf16.msra.mxu1 %v4101_v28  ;;  %3820 = vmatprep.subr.bf16.mxu0 %v4111_v55 }
  0x6d   : > { %3770 = vmatprep.subr.bf16.mxu1 %v4102_v30 }
  0x6f   : > { %3739 = vmatmul.mubr.bf16.vlgmr.msra.gmra.mxu1 %v4079_v23  ;;  %3821 = vmatpush3.bf16.msra.mxu0 %v4111_v55 }
  0x70   : > { %3742 = vmatprep.mubr.bf16.mxu1 %v4080_v26  ;;  %3771 = vmatpush3.bf16.msra.mxu1 %v4102_v30 }
  0x71   : > { %3772 = vmatprep.subr.bf16.mxu1 %v4103_v31  ;;  %3822 = vmatprep.subr.bf16.mxu0 %v4112_v61 }
  0x72   : > { %758 = vmatmul.mubr.bf16.gmra.mxu0 %v4079_v23 }
  0x73   : > { %767 = vmatprep.mubr.bf16.mxu0 %v4492_v1  ;;  %3823 = vmatpush3.bf16.msra.mxu0 %v4112_v61 }
  0x74   : > { %3773 = vmatpush3.bf16.msra.mxu1 %v4103_v31  ;;  %3824 = vmatprep.subr.bf16.mxu0 %v4113_v2 }
  0x75   : > { %3774 = vmatprep.subr.bf16.mxu1 %v4104_v33 }
  0x77   : > { %3743 = vmatmul.mubr.bf16.gmra.mxu1 %v4081_v29  ;;  %3825 = vmatpush3.bf16.msra.mxu0 %v4113_v2 }
  0x78   : > { %3746 = vmatprep.mubr.bf16.mxu1 %v4082_v32  ;;  %3775 = vmatpush3.bf16.msra.mxu1 %v4104_v33 }
  0x79   : > { %3776 = vmatprep.subr.bf16.mxu1 %v4105_v34  ;;  %3826 = vmatprep.subr.bf16.mxu0 %v4114_v8 }
  0x7a   : > { %768 = vmatmul.mubr.bf16.gmra.mxu0 %v4080_v26 }
  0x7b   : > { %777 = vmatprep.mubr.bf16.mxu0 %v4492_v1  ;;  %3827 = vmatpush3.bf16.msra.mxu0 %v4114_v8 }
  0x7c   : > { %3777 = vmatpush3.bf16.msra.mxu1 %v4105_v34 }
  0x7d   : > { %3778 = vmatprep.subr.bf16.mxu1 %v4106_v43 }
  0x7f   : > { %3747 = vmatmul.mubr.bf16.gmra.mxu1 %v4083_v35 }
  0x80   : > { %3750 = vmatprep.mubr.bf16.mxu1 %v4084_v36  ;;  %3779 = vmatpush3.bf16.msra.mxu1 %v4106_v43 }
  0x81   : > { %3780 = vmatprep.subr.bf16.mxu1 %v4107_v44 }
  0x82   : > { %778 = vmatmul.mubr.bf16.gmra.mxu0 %v4081_v29 }
  0x83   : > { %787 = vmatprep.mubr.bf16.mxu0 %v4492_v1 }
  0x84   : > { %3781 = vmatpush3.bf16.msra.mxu1 %v4107_v44 }
  0x85   : > { %3782 = vmatprep.subr.bf16.mxu1 %v4108_v47 }
  0x87   : > { %3751 = vmatmul.mubr.bf16.gmra.mxu1 %v4085_v37 }
  0x88   : > { %3754 = vmatprep.mubr.bf16.mxu1 %v4086_v38  ;;  %3783 = vmatpush3.bf16.msra.mxu1 %v4108_v47 }
  0x89   : > { %3784 = vmatprep.subr.bf16.mxu1 %v4109_v48 }
  0x8a   : > { %788 = vmatmul.mubr.bf16.gmra.mxu0 %v4082_v32 }
  0x8b   : > { %797 = vmatprep.mubr.bf16.mxu0 %v4492_v1 }
  0x8c   : > { %3785 = vmatpush3.bf16.msra.mxu1 %v4109_v48 }
  0x8f   : > { %3755 = vmatmul.mubr.bf16.gmra.mxu1 %v4087_v39 }
  0x90   : > { %3758 = vmatprep.mubr.bf16.mxu1 %v4088_v40 }
  0x92   : > { %798 = vmatmul.mubr.bf16.gmra.mxu0 %v4083_v35 }
  0x93   : > { %807 = vmatprep.mubr.bf16.mxu0 %v4492_v1 }
  0x97   : > { %3759 = vmatmul.mubr.bf16.gmra.mxu1 %v4089_v41 }
  0x98   : > { %3762 = vmatprep.mubr.bf16.mxu1 %v4090_v42 }
  0x9a   : > { %808 = vmatmul.mubr.bf16.gmra.mxu0 %v4084_v36 }
  0x9b   : > { %817 = vmatprep.mubr.bf16.mxu0 %v4492_v1 }
  0x9f   : > { %3763 = vmatmul.mubr.bf16.gmra.mxu1 %v4091_v45 }
  0xa0   : > { %3766 = vmatprep.mubr.bf16.mxu1 %v4092_v46 }
  0xa2   : > { %818 = vmatmul.mubr.bf16.gmra.mxu0 %v4085_v37 }
  0xa3   : > { %827 = vmatprep.mubr.bf16.mxu0 %v4492_v1 }
  0xa7   : > { %3767 = vmatmul.mubr.bf16.gmra.mxu1 %v4095_v49 }
  0xaa   : > { %828 = vmatmul.mubr.bf16.gmra.mxu0 %v4086_v38 }
  0xab   : > { %837 = vmatprep.mubr.bf16.mxu0 %v4492_v1 }
  0xb2   : > { %838 = vmatmul.mubr.bf16.gmra.mxu0 %v4087_v39 }
  0xb3   : > { %847 = vmatprep.mubr.bf16.mxu0 %v4492_v1 }
  0xba   : > { %848 = vmatmul.mubr.bf16.gmra.mxu0 %v4088_v40 }
  0xbb   : > { %857 = vmatprep.mubr.bf16.mxu0 %v4492_v1 }
  0xc2   : > { %858 = vmatmul.mubr.bf16.gmra.mxu0 %v4089_v41 }
  0xc3   : > { %867 = vmatprep.mubr.bf16.mxu0 %v4492_v1 }
  0xca   : > { %868 = vmatmul.mubr.bf16.gmra.mxu0 %v4090_v42 }
  0xcb   : > { %877 = vmatprep.mubr.bf16.mxu0 %v4492_v1 }
  0xd2   : > { %878 = vmatmul.mubr.bf16.gmra.mxu0 %v4091_v45 }
  0xd3   : > { %887 = vmatprep.mubr.bf16.mxu0 %v4492_v1 }
  0xda   : > { %888 = vmatmul.mubr.bf16.gmra.mxu0 %v4092_v46 }
  0xdb   : > { %897 = vmatprep.mubr.bf16.mxu0 %v4492_v1 }
  0xe2   : > { %898 = vmatmul.mubr.bf16.gmra.mxu0 %v4095_v49 }
 0x12a   : > { %v749_v50 = vpop.f32.mrf.mxu0 }
 0x12b   : > { %v1074_v53 = vadd.f32 %v4730_v51, %v749_v50 }
 0x12c   : > { %v4732_v52 = vpop.f32.mrf.mxu0 }
 0x12d   : > { %v1106_v59 = vmax.f32 %v1074_v53, 0.0 }
 0x12e   : > { %v753_v56 = vpop.f32.mrf.mxu0 }
 0x12f   : > { %v1075_v57 = vadd.f32 %v4730_v51, %v753_v56  ;;  %v4767_v21 = vpop.f32.mrf.mxu1 }
 0x130   : > { %v4742_v58 = vpop.f32.mrf.mxu0  ;;  %5633 = vst [vmem:[#allocation10_spill] sm:$0xff] %v4767_v21 }
 0x131   : > { %v1107_v60 = vmax.f32 %v1075_v57, 0.0  ;;  %v4770_v24 = vpop.f32.mrf.mxu1 }
 0x132   : > { %v759_v62 = vpop.f32.mrf.mxu0 }
 0x133   : > { %v1177_v63 = vpack.c.bf16 %v1107_v60, %v1106_v59  ;;  %v1076_v1 = vadd.f32 %v4730_v51, %v759_v62  ;;  %v4775_v27 = vpop.f32.mrf.mxu1 }
 0x134   : > { %v4747_v0 = vpop.f32.mrf.mxu0  ;;  %5634 = vst [vmem:[#allocation11_spill] sm:$0xff] %v4775_v27 }
 0x135   : > { %3786 = vmatprep.mubr.bf16.mxu1 %v1177_v63  ;;  %v1108_v6 = vmax.f32 %v1076_v1, 0.0  ;;  %v4777_v31 = vpop.f32.mrf.mxu1 }
 0x136   : > { %v763_v3 = vpop.f32.mrf.mxu0  ;;  %5635 = vst [vmem:[#allocation12_spill] sm:$0xff] %v4777_v31 }
 0x137   : > { %v1077_v4 = vadd.f32 %v4730_v51, %v763_v3  ;;  %v4781_v34 = vpop.f32.mrf.mxu1 }
 0x138   : > { %v4754_v5 = vpop.f32.mrf.mxu0 }
 0x139   : > { %v1109_v7 = vmax.f32 %v1077_v4, 0.0  ;;  %v4784_v37 = vpop.f32.mrf.mxu1 }
 0x13a   : > { %v769_v9 = vpop.f32.mrf.mxu0 }
 0x13b   : > { %v1178_v10 = vpack.c.bf16 %v1109_v7, %v1108_v6  ;;  %v1078_v12 = vadd.f32 %v4730_v51, %v769_v9  ;;  %v4789_v40 = vpop.f32.mrf.mxu1 }
 0x13c   : > { %v4759_v11 = vpop.f32.mrf.mxu0 }
 0x13d   : > { %3787 = vmatmul.mubr.bf16.vlgmr.msra.gmra.mxu1 %v1178_v10  ;;  %v1110_v16 = vmax.f32 %v1078_v12, 0.0  ;;  %v4791_v44 = vpop.f32.mrf.mxu1 }
 0x13e   : > { %v773_v13 = vpop.f32.mrf.mxu0  ;;  %5636 = vst [vmem:[#allocation13_spill] sm:$0xff] %v4791_v44 }
 0x13f   : > { %v1079_v14 = vadd.f32 %v4730_v51, %v773_v13  ;;  %v4795_v47 = vpop.f32.mrf.mxu1 }
 0x140   : > { %v4763_v15 = vpop.f32.mrf.mxu0 }
 0x141   : > { %v1111_v17 = vmax.f32 %v1079_v14, 0.0  ;;  %v4798_v50 = vpop.f32.mrf.mxu1 }
 0x142   : > { %v779_v18 = vpop.f32.mrf.mxu0 }
 0x143   : > { %v1179_v19 = vpack.c.bf16 %v1111_v17, %v1110_v16  ;;  %v1080_v22 = vadd.f32 %v4730_v51, %v779_v18  ;;  %v4803_v55 = vpop.f32.mrf.mxu1  ;;  %v4826_v16 = vld [vmem:[%s5612_s8] ss:$0 sm:$0xff] }
 0x144   : > { %v4765_v20 = vpop.f32.mrf.mxu0 }
 0x145   : > { %3790 = vmatprep.mubr.bf16.mxu1 %v1179_v19  ;;  %v1112_v28 = vmax.f32 %v1080_v22, 0.0  ;;  %v4805_v60 = vpop.f32.mrf.mxu1 }
 0x146   : > { %v783_v23 = vpop.f32.mrf.mxu0  ;;  %5637 = vst [vmem:[#allocation14_spill] sm:$0xff] %v4805_v60 }
 0x147   : > { %v1081_v25 = vadd.f32 %v4730_v51, %v783_v23  ;;  %v4809_v63 = vpop.f32.mrf.mxu1 }
 0x148   : > { %v4773_v26 = vpop.f32.mrf.mxu0 }
 0x149   : > { %v1113_v29 = vmax.f32 %v1081_v25, 0.0  ;;  %v4812_v3 = vpop.f32.mrf.mxu1 }
 0x14a   : > { %v789_v30 = vpop.f32.mrf.mxu0 }
 0x14b   : > { %v1180_v32 = vpack.c.bf16 %v1113_v29, %v1112_v28  ;;  %v1082_v35 = vadd.f32 %v4730_v51, %v789_v30  ;;  %v4817_v7 = vpop.f32.mrf.mxu1 }
 0x14c   : > { %v4779_v33 = vpop.f32.mrf.mxu0 }
 0x14d   : > { %3791 = vmatmul.mubr.bf16.gmra.mxu1 %v1180_v32  ;;  %v1114_v41 = vmax.f32 %v1082_v35, 0.0  ;;  %v4819_v12 = vpop.f32.mrf.mxu1 }
 0x14e   : > { %v793_v36 = vpop.f32.mrf.mxu0  ;;  %5638 = vst [vmem:[#allocation15_spill] sm:$0xff] %v4819_v12 }
 0x14f   : > { %v1083_v38 = vadd.f32 %v4730_v51, %v793_v36  ;;  %v3756_v17 = vpop.f32.mrf.mxu1 }
 0x150   : > { %v4787_v39 = vpop.f32.mrf.mxu0  ;;  %v4830_v19 = vadd.f32 %v3756_v17, %v4826_v16 }
 0x151   : > { %v1115_v42 = vmax.f32 %v1083_v38, 0.0  ;;  %v1006_v23 = vpop.f32.mrf.mxu1 }
 0x152   : > { %v799_v43 = vpop.f32.mrf.mxu0  ;;  %v4834_v28 = vadd.f32 %v4826_v16, %v1006_v23 }
 0x153   : > { %v1181_v45 = vpack.c.bf16 %v1115_v42, %v1114_v41  ;;  %v1084_v48 = vadd.f32 %v4730_v51, %v799_v43  ;;  %v3757_v30 = vpop.f32.mrf.mxu1 }
 0x154   : > { %v4793_v46 = vpop.f32.mrf.mxu0  ;;  %v4839_v36 = vadd.f32 %v3757_v30, %v4826_v16 }
 0x155   : > { %3794 = vmatprep.mubr.bf16.mxu1 %v1181_v45  ;;  %v1116_v56 = vmax.f32 %v1084_v48, 0.0  ;;  %v1009_v41 = vpop.f32.mrf.mxu1 }
 0x156   : > { %v803_v49 = vpop.f32.mrf.mxu0  ;;  %v4842_v43 = vadd.f32 %v4826_v16, %v1009_v41 }
 0x157   : > { %v1085_v53 = vadd.f32 %v4730_v51, %v803_v49  ;;  %v3760_v48 = vpop.f32.mrf.mxu1 }
 0x158   : > { %v4801_v54 = vpop.f32.mrf.mxu0 }
 0x159   : > { %v1117_v57 = vmax.f32 %v1085_v53, 0.0  ;;  %v4848_v53 = vadd.f32 %v3760_v48, %v4826_v16 }
 0x15a   : > { %v809_v59 = vpop.f32.mrf.mxu0 }
 0x15b   : > { %v1182_v61 = vpack.c.bf16 %v1117_v57, %v1116_v56  ;;  %v1086_v1 = vadd.f32 %v4730_v51, %v809_v59  ;;  %v1022_v57 = vpop.f32.mrf.mxu1 }
 0x15c   : > { %v4807_v62 = vpop.f32.mrf.mxu0 }
 0x15d   : > { %3795 = vmatmul.mubr.bf16.gmra.mxu1 %v1182_v61  ;;  %v1118_v8 = vmax.f32 %v1086_v1, 0.0  ;;  %v4852_v61 = vadd.f32 %v4826_v16, %v1022_v57 }
 0x15e   : > { %v813_v2 = vpop.f32.mrf.mxu0 }
 0x15f   : > { %v1087_v4 = vadd.f32 %v4730_v51, %v813_v2  ;;  %v3761_v2 = vpop.f32.mrf.mxu1 }
 0x160   : > { %v4815_v6 = vpop.f32.mrf.mxu0 }
 0x161   : > { %v1119_v9 = vmax.f32 %v1087_v4, 0.0 }
 0x162   : > { %v819_v10 = vpop.f32.mrf.mxu0 }
 0x163   : > { %v1183_v13 = vpack.c.bf16 %v1119_v9, %v1118_v8  ;;  %v1088_v18 = vadd.f32 %v4730_v51, %v819_v10  ;;  %v4857_v9 = vadd.f32 %v3761_v2, %v4826_v16 }
 0x164   : > { %v4821_v14 = vpop.f32.mrf.mxu0 }
 0x165   : > { %3798 = vmatprep.mubr.bf16.mxu1 %v1183_v13  ;;  %v1120_v32 = vmax.f32 %v1088_v18, 0.0  ;;  %v1025_v13 = vpop.f32.mrf.mxu1 }
 0x166   : > { %v823_v22 = vpop.f32.mrf.mxu0  ;;  %v4860_v18 = vadd.f32 %v4826_v16, %v1025_v13 }
 0x167   : > { %v1089_v25 = vadd.f32 %v4730_v51, %v823_v22  ;;  %v3764_v23 = vpop.f32.mrf.mxu1 }
 0x168   : > { %v4836_v29 = vpop.f32.mrf.mxu0  ;;  %v4866_v30 = vadd.f32 %v3764_v23, %v4826_v16 }
 0x169   : > { %v1121_v35 = vmax.f32 %v1089_v25, 0.0 }
 0x16a   : > { %v829_v38 = vpop.f32.mrf.mxu0 }
 0x16b   : > { %v1184_v42 = vpack.c.bf16 %v1121_v35, %v1120_v32  ;;  %v1090_v49 = vadd.f32 %v4730_v51, %v829_v38  ;;  %v1038_v35 = vpop.f32.mrf.mxu1 }
 0x16c   : > { %v4844_v45 = vpop.f32.mrf.mxu0  ;;  %v4870_v41 = vadd.f32 %v4826_v16, %v1038_v35 }
 0x16d   : > { %3799 = vmatmul.mubr.bf16.gmra.mxu1 %v1184_v42  ;;  %v1122_v4 = vmax.f32 %v1090_v49, 0.0  ;;  %v3765_v48 = vpop.f32.mrf.mxu1 }
 0x16e   : > { %v833_v56 = vpop.f32.mrf.mxu0  ;;  %v4875_v57 = vadd.f32 %v3765_v48, %v4826_v16 }
 0x16f   : > { %v1091_v59 = vadd.f32 %v4730_v51, %v833_v56  ;;  %v1041_v2 = vpop.f32.mrf.mxu1 }
 0x170   : > { %v4854_v1 = vpop.f32.mrf.mxu0 }
 0x171   : > { %v1123_v8 = vmax.f32 %v1091_v59, 0.0  ;;  %v3768_v13 = vpop.f32.mrf.mxu1 }
 0x172   : > { %v839_v10 = vpop.f32.mrf.mxu0  ;;  %v4884_v23 = vadd.f32 %v3768_v13, %v4826_v16  ;;  %v4116_v13 = vld [vmem:[%s5607_s3 + $0x8] sm:$0xff]  }
 0x173   : > { %v1185_v17 = vpack.c.bf16 %v1123_v8, %v1122_v4  ;;  %v1092_v25 = vadd.f32 %v4730_v51, %v839_v10  ;;  %v4878_v8 = vadd.f32 %v4826_v16, %v1041_v2  ;;  %v1054_v35 = vpop.f32.mrf.mxu1 }
 0x174   : > { %v4862_v22 = vpop.f32.mrf.mxu0  ;;  %v4891_v48 = vadd.f32 %v4826_v16, %v1054_v35 }
 0x175   : > { %3802 = vmatprep.mubr.bf16.mxu1 %v1185_v17  ;;  %v1124_v49 = vmax.f32 %v1092_v25, 0.0  ;;  %v4115_v25 = vld [vmem:[%s5607_s3 + $0x10] sm:$0xff]  }
 0x176   : > { %v843_v32 = vpop.f32.mrf.mxu0  ;;  %5640 = vst [vmem:[#allocation17_spill] sm:$0xff] %v4891_v48  ;;  %3828 = vmatprep.subr.bf16.mxu0 %v4115_v25 }
 0x177   : > { %v1093_v38 = vadd.f32 %v4730_v51, %v843_v32  ;;  %3829 = vmatpush3.bf16.msra.mxu0 %v4115_v25 }
 0x178   : > { %v4872_v42 = vpop.f32.mrf.mxu0  ;;  %3830 = vmatprep.subr.bf16.mxu0 %v4116_v13 }
 0x179   : > { %v1125_v56 = vmax.f32 %v1093_v38, 0.0 }
 0x17a   : > { %v849_v59 = vpop.f32.mrf.mxu0 }
 0x17b   : > { %v1186_v4 = vpack.c.bf16 %v1125_v56, %v1124_v49  ;;  %v1094_v17 = vadd.f32 %v4730_v51, %v849_v59  ;;  %v3769_v56 = vpop.f32.mrf.mxu1  ;;  %3831 = vmatpush3.bf16.msra.mxu0 %v4116_v13 }
 0x17c   : > { %v4880_v10 = vpop.f32.mrf.mxu0 }
 0x17d   : > { %5639 = vst [vmem:[#allocation16_spill] sm:$0xff] %v4880_v10  ;;  %3803 = vmatmul.mubr.bf16.gmra.mxu1 %v1186_v4  ;;  %v1126_v59 = vmax.f32 %v1094_v17, 0.0  ;;  %v4896_v4 = vadd.f32 %v3769_v56, %v4826_v16  ;;  %v4117_v17 = vld [vmem:[%s5607_s3] sm:$0xff]  }
 0x17e   : > { %v853_v32 = vpop.f32.mrf.mxu0  ;;  %3832 = vmatprep.subr.bf16.mxu0 %v4117_v17 }
 0x17f   : > { %v1095_v38 = vadd.f32 %v4730_v51, %v853_v32  ;;  %3833 = vmatpush3.bf16.msra.mxu0 %v4117_v17 }
 0x180   : > { %v4893_v49 = vpop.f32.mrf.mxu0 }
 0x181   : > { %5641 = vst [vmem:[#allocation18_spill] sm:$0xff] %v4893_v49  ;;  %v1127_v2 = vmax.f32 %v1095_v38, 0.0 }
 0x182   : > { %v859_v12 = vpop.f32.mrf.mxu0 }
 0x183   : > { %v1187_v60 = vpack.c.bf16 %v1127_v2, %v1126_v59  ;;  %v1096_v35 = vadd.f32 %v4730_v51, %v859_v12 }
 0x184   : > { %v4901_v32 = vpop.f32.mrf.mxu0 }
 0x185   : > { %3806 = vmatprep.mubr.bf16.mxu1 %v1187_v60  ;;  %v1128_v56 = vmax.f32 %v1096_v35, 0.0 }
 0x186   : > { %v863_v25 = vpop.f32.mrf.mxu0 }
 0x187   : > { %v1097_v16 = vadd.f32 %v4730_v51, %v863_v25 }
 0x188   : > { %v4908_v38 = vpop.f32.mrf.mxu0 }
 0x189   : > { %5642 = vst [vmem:[#allocation19_spill] sm:$0xff] %v4908_v38  ;;  %v1129_v59 = vmax.f32 %v1097_v16, 0.0 }
 0x18a   : > { %v869_v2 = vpop.f32.mrf.mxu0 }
 0x18b   : > { %v1188_v48 = vpack.c.bf16 %v1129_v59, %v1128_v56  ;;  %v1098_v12 = vadd.f32 %v4730_v51, %v869_v2 }
 0x18c   : > { %v4910_v44 = vpop.f32.mrf.mxu0 }
 0x18d   : > { %5643 = vst [vmem:[#allocation20_spill] sm:$0xff] %v4910_v44  ;;  %3807 = vmatmul.mubr.bf16.gmra.mxu1 %v1188_v48  ;;  %v1130_v27 = vmax.f32 %v1098_v12, 0.0 }
 0x18e   : > { %v873_v60 = vpop.f32.mrf.mxu0 }
 0x18f   : > { %v1099_v13 = vadd.f32 %v4730_v51, %v873_v60 }
 0x190   : > { %v4914_v31 = vpop.f32.mrf.mxu0 }
 0x191   : > { %5644 = vst [vmem:[#allocation21_spill] sm:$0xff] %v4914_v31  ;;  %v1131_v25 = vmax.f32 %v1099_v13, 0.0 }
 0x192   : > { %v879_v21 = vpop.f32.mrf.mxu0 }
 0x193   : > { %v1189_v49 = vpack.c.bf16 %v1131_v25, %v1130_v27  ;;  %v1100_v35 = vadd.f32 %v4730_v51, %v879_v21 }
 0x194   : > { %v4916_v38 = vpop.f32.mrf.mxu0 }
 0x195   : > { %5645 = vst [vmem:[#allocation22_spill] sm:$0xff] %v4916_v38  ;;  %3810 = vmatprep.mubr.bf16.mxu1 %v1189_v49  ;;  %v1132_v48 = vmax.f32 %v1100_v35, 0.0 }
 0x196   : > { %v883_v17 = vpop.f32.mrf.mxu0 }
 0x197   : > { %v1101_v16 = vadd.f32 %v4730_v51, %v883_v17 }
 0x198   : > { %v4920_v56 = vpop.f32.mrf.mxu0 }
 0x199   : > { %5646 = vst [vmem:[#allocation23_spill] sm:$0xff] %v4920_v56  ;;  %v1133_v59 = vmax.f32 %v1101_v16, 0.0 }
 0x19a   : > { %v889_v2 = vpop.f32.mrf.mxu0 }
 0x19b   : > { %v1190_v60 = vpack.c.bf16 %v1133_v59, %v1132_v48  ;;  %v1102_v12 = vadd.f32 %v4730_v51, %v889_v2 }
 0x19c   : > { %v4922_v44 = vpop.f32.mrf.mxu0 }
 0x19d   : > { %5647 = vst [vmem:[#allocation24_spill] sm:$0xff] %v4922_v44  ;;  %3811 = vmatmul.mubr.bf16.gmra.mxu1 %v1190_v60  ;;  %v1134_v21 = vmax.f32 %v1102_v12, 0.0  ;;  %v4932_v44 = vpop.f32.mrf.mxu1  ;;  %v4937_v12 = vld [vmem:[%s5611_s7 + $0x1] ss:$0 sm:$0xff] }
 0x19e   : > { %v893_v27 = vpop.f32.mrf.mxu0  ;;  %5650 = vst [vmem:[#allocation27_spill] sm:$0xff] %v4932_v44 }
 0x19f   : > { %v1103_v13 = vadd.f32 %v4730_v51, %v893_v27 }
 0x1a0   : > { %v4926_v25 = vpop.f32.mrf.mxu0 }
 0x1a1   : > { %5648 = vst [vmem:[#allocation25_spill] sm:$0xff] %v4926_v25  ;;  %v1135_v49 = vmax.f32 %v1103_v13, 0.0 }
 0x1a2   : > { %v899_v31 = vpop.f32.mrf.mxu0 }
 0x1a3   : > { %v1191_v17 = vpack.c.bf16 %v1135_v49, %v1134_v21  ;;  %v1104_v35 = vadd.f32 %v4730_v51, %v899_v31 }
 0x1a4   : > { %v4928_v38 = vpop.f32.mrf.mxu0 }
 0x1a5   : > { %5649 = vst [vmem:[#allocation26_spill] sm:$0xff] %v4928_v38  ;;  %3814 = vmatprep.mubr.bf16.mxu1 %v1191_v17  ;;  %v1136_v59 = vmax.f32 %v1104_v35, 0.0 }
 0x1a6   : > { %v903_v16 = vpop.f32.mrf.mxu0 }
 0x1a7   : > { %v1105_v48 = vadd.f32 %v4730_v51, %v903_v16 }
 0x1a9   : > { %v1137_v2 = vmax.f32 %v1105_v48, 0.0 }
 0x1ab   : > { %v1192_v60 = vpack.c.bf16 %v1137_v2, %v1136_v59 }
 0x1ad   : > { %3815 = vmatmul.mubr.bf16.gmra.mxu1 %v1192_v60 }
 0x1fd   : > { %v3788_v27 = vpop.f32.mrf.mxu1 }
 0x1fe   : > { %v1305_v51 = vadd.f32 %v3788_v27, %v4937_v12 }
 0x1ff   : > { %v1296_v25 = vpop.f32.mrf.mxu1 }
 0x200   : > { %v1297_v31 = vadd.f32 %v4937_v12, %v1296_v25  ;;  %v1425_v59 = vmax.f32 %v1305_v51, 0.0 }
 0x201   : > { %v3789_v13 = vpop.f32.mrf.mxu1 }
 0x202   : > { %v1308_v21 = vadd.f32 %v3789_v13, %v4937_v12  ;;  %v1423_v16 = vmax.f32 %v1297_v31, 0.0 }
 0x203   : > { %v1299_v49 = vpop.f32.mrf.mxu1 }
 0x204   : > { %v1300_v17 = vadd.f32 %v4937_v12, %v1299_v49  ;;  %v1426_v35 = vmax.f32 %v1308_v21, 0.0 }
 0x206   : > { %v1424_v48 = vmax.f32 %v1300_v17, 0.0  ;;  %v1456_v60 = vpack.c.bf16 %v1426_v35, %v1425_v59 }
 0x208   : > { %v1455_v2 = vpack.c.bf16 %v1424_v48, %v1423_v16 }
 0x20a   : > { %3834 = vmatprep.mubr.bf16.mxu0 %v1455_v2 }
 0x20b   : > { %3835 = vmatmul.mubr.bf16.vlgmr.msra.gmra.mxu0 %v1456_v60 }
 0x20d   : > { %v3792_v44 = vpop.f32.mrf.mxu1 }
 0x20e   : > { %v1321_v27 = vadd.f32 %v3792_v44, %v4937_v12 }
 0x20f   : > { %v1312_v38 = vpop.f32.mrf.mxu1 }
 0x210   : > { %v1313_v25 = vadd.f32 %v4937_v12, %v1312_v38  ;;  %v1429_v51 = vmax.f32 %v1321_v27, 0.0 }
 0x211   : > { %v3793_v56 = vpop.f32.mrf.mxu1 }
 0x212   : > { %v1324_v13 = vadd.f32 %v3793_v56, %v4937_v12  ;;  %v1427_v31 = vmax.f32 %v1313_v25, 0.0 }
 0x213   : > { %v1315_v10 = vpop.f32.mrf.mxu1 }
 0x214   : > { %v1316_v49 = vadd.f32 %v4937_v12, %v1315_v10  ;;  %v1430_v21 = vmax.f32 %v1324_v13, 0.0 }
 0x216   : > { %v1428_v17 = vmax.f32 %v1316_v49, 0.0  ;;  %v1458_v35 = vpack.c.bf16 %v1430_v21, %v1429_v51 }
 0x218   : > { %v1457_v16 = vpack.c.bf16 %v1428_v17, %v1427_v31 }
 0x21a   : > { %3838 = vmatprep.mubr.bf16.mxu0 %v1457_v16 }
 0x21b   : > { %3839 = vmatmul.mubr.bf16.gmra.mxu0 %v1458_v35 }
 0x21d   : > { %v3796_v48 = vpop.f32.mrf.mxu1 }
 0x21e   : > { %v1337_v44 = vadd.f32 %v3796_v48, %v4937_v12 }
 0x21f   : > { %v1328_v59 = vpop.f32.mrf.mxu1 }
 0x220   : > { %v1329_v38 = vadd.f32 %v4937_v12, %v1328_v59  ;;  %v1433_v27 = vmax.f32 %v1337_v44, 0.0 }
 0x221   : > { %v3797_v2 = vpop.f32.mrf.mxu1 }
 0x222   : > { %v1340_v56 = vadd.f32 %v3797_v2, %v4937_v12  ;;  %v1431_v25 = vmax.f32 %v1329_v38, 0.0 }
 0x223   : > { %v1331_v60 = vpop.f32.mrf.mxu1 }
 0x224   : > { %v1332_v10 = vadd.f32 %v4937_v12, %v1331_v60  ;;  %v1434_v13 = vmax.f32 %v1340_v56, 0.0 }
 0x226   : > { %v1432_v49 = vmax.f32 %v1332_v10, 0.0  ;;  %v1460_v21 = vpack.c.bf16 %v1434_v13, %v1433_v27 }
 0x228   : > { %v1459_v31 = vpack.c.bf16 %v1432_v49, %v1431_v25 }
 0x22a   : > { %3842 = vmatprep.mubr.bf16.mxu0 %v1459_v31 }
 0x22b   : > { %3843 = vmatmul.mubr.bf16.gmra.mxu0 %v1460_v21 }
 0x22d   : > { %v3800_v17 = vpop.f32.mrf.mxu1 }
 0x22e   : > { %v1353_v48 = vadd.f32 %v3800_v17, %v4937_v12 }
 0x22f   : > { %v1344_v51 = vpop.f32.mrf.mxu1 }
 0x230   : > { %v1345_v35 = vadd.f32 %v4937_v12, %v1344_v51  ;;  %v1437_v44 = vmax.f32 %v1353_v48, 0.0 }
 0x231   : > { %v3801_v16 = vpop.f32.mrf.mxu1 }
 0x232   : > { %v1356_v59 = vadd.f32 %v3801_v16, %v4937_v12  ;;  %v1435_v38 = vmax.f32 %v1345_v35, 0.0 }
 0x233   : > { %v1347_v2 = vpop.f32.mrf.mxu1 }
 0x234   : > { %v1348_v60 = vadd.f32 %v4937_v12, %v1347_v2  ;;  %v1438_v56 = vmax.f32 %v1356_v59, 0.0 }
 0x236   : > { %v1436_v10 = vmax.f32 %v1348_v60, 0.0  ;;  %v1462_v13 = vpack.c.bf16 %v1438_v56, %v1437_v44 }
 0x238   : > { %v1461_v25 = vpack.c.bf16 %v1436_v10, %v1435_v38 }
 0x23a   : > { %3846 = vmatprep.mubr.bf16.mxu0 %v1461_v25 }
 0x23b   : > { %3847 = vmatmul.mubr.bf16.gmra.mxu0 %v1462_v13 }
 0x23d   : > { %v3804_v49 = vpop.f32.mrf.mxu1 }
 0x23e   : > { %v1369_v17 = vadd.f32 %v3804_v49, %v4937_v12 }
 0x23f   : > { %v1360_v27 = vpop.f32.mrf.mxu1 }
 0x240   : > { %v1361_v21 = vadd.f32 %v4937_v12, %v1360_v27  ;;  %v1441_v48 = vmax.f32 %v1369_v17, 0.0 }
 0x241   : > { %v3805_v31 = vpop.f32.mrf.mxu1 }
 0x242   : > { %v1372_v51 = vadd.f32 %v3805_v31, %v4937_v12  ;;  %v1439_v35 = vmax.f32 %v1361_v21, 0.0 }
 0x243   : > { %v1363_v16 = vpop.f32.mrf.mxu1 }
 0x244   : > { %v1364_v2 = vadd.f32 %v4937_v12, %v1363_v16  ;;  %v1442_v59 = vmax.f32 %v1372_v51, 0.0 }
 0x246   : > { %v1440_v60 = vmax.f32 %v1364_v2, 0.0  ;;  %v1464_v56 = vpack.c.bf16 %v1442_v59, %v1441_v48 }
 0x248   : > { %v1463_v38 = vpack.c.bf16 %v1440_v60, %v1439_v35 }
 0x24a   : > { %3850 = vmatprep.mubr.bf16.mxu0 %v1463_v38 }
 0x24b   : > { %3851 = vmatmul.mubr.bf16.gmra.mxu0 %v1464_v56 }
 0x24d   : > { %v3808_v10 = vpop.f32.mrf.mxu1 }
 0x24e   : > { %v1385_v49 = vadd.f32 %v3808_v10, %v4937_v12 }
 0x24f   : > { %v1376_v44 = vpop.f32.mrf.mxu1 }
 0x250   : > { %v1377_v13 = vadd.f32 %v4937_v12, %v1376_v44  ;;  %v1445_v17 = vmax.f32 %v1385_v49, 0.0 }
 0x251   : > { %v3809_v25 = vpop.f32.mrf.mxu1 }
 0x252   : > { %v1388_v27 = vadd.f32 %v3809_v25, %v4937_v12  ;;  %v1443_v21 = vmax.f32 %v1377_v13, 0.0 }
 0x253   : > { %v1379_v31 = vpop.f32.mrf.mxu1 }
 0x254   : > { %v1380_v16 = vadd.f32 %v4937_v12, %v1379_v31  ;;  %v1446_v51 = vmax.f32 %v1388_v27, 0.0 }
 0x256   : > { %v1444_v2 = vmax.f32 %v1380_v16, 0.0  ;;  %v1466_v59 = vpack.c.bf16 %v1446_v51, %v1445_v17 }
 0x258   : > { %v1465_v35 = vpack.c.bf16 %v1444_v2, %v1443_v21 }
 0x25a   : > { %3854 = vmatprep.mubr.bf16.mxu0 %v1465_v35 }
 0x25b   : > { %3855 = vmatmul.mubr.bf16.gmra.mxu0 %v1466_v59 }
 0x25d   : > { %v3812_v60 = vpop.f32.mrf.mxu1 }
 0x25e   : > { %v1401_v10 = vadd.f32 %v3812_v60, %v4937_v12 }
 0x25f   : > { %v1392_v48 = vpop.f32.mrf.mxu1 }
 0x260   : > { %v1393_v56 = vadd.f32 %v4937_v12, %v1392_v48  ;;  %v1449_v49 = vmax.f32 %v1401_v10, 0.0 }
 0x261   : > { %v3813_v38 = vpop.f32.mrf.mxu1 }
 0x262   : > { %v1404_v44 = vadd.f32 %v3813_v38, %v4937_v12  ;;  %v1447_v13 = vmax.f32 %v1393_v56, 0.0  ;;  %v1948_v56 = vld [vmem:[%s5608_s4] sm:$0x3] }
 0x263   : > { %v1395_v25 = vpop.f32.mrf.mxu1  ;;  %3996 = vmatprep.subr.msk.bf16.mxu1 %vm1998_vm0, %v1948_v56  ;;  %v2000_v10 = vsel %vm1998_vm0, %v1948_v56, 0 }
 0x264   : > { %v1396_v31 = vadd.f32 %v4937_v12, %v1395_v25  ;;  %v1450_v27 = vmax.f32 %v1404_v44, 0.0  ;;  %3867 = vmatpush3.bf16.msra.mxu1 %v2000_v10 }
 0x266   : > { %v1448_v16 = vmax.f32 %v1396_v31, 0.0  ;;  %v1468_v51 = vpack.c.bf16 %v1450_v27, %v1449_v49 }
 0x268   : > { %v1467_v21 = vpack.c.bf16 %v1448_v16, %v1447_v13 }
 0x26a   : > { %3858 = vmatprep.mubr.bf16.mxu0 %v1467_v21  ;;  %v4974_v21 = vpop.f32.mrf.mxu0 }
 0x26b   : > { %3859 = vmatmul.mubr.bf16.gmra.mxu0 %v1468_v51  ;;  %5651 = vst [vmem:[#allocation28_spill] sm:$0xff] %v4974_v21  ;;  %v4979_v51 = vld [vmem:[%s5613_s9] ss:$0 sm:$0xff] }
 0x26d   : > { %v3816_v2 = vpop.f32.mrf.mxu1 }
 0x26e   : > { %v1417_v60 = vadd.f32 %v3816_v2, %v4937_v12 }
 0x26f   : > { %v1408_v17 = vpop.f32.mrf.mxu1 }
 0x270   : > { %v1409_v59 = vadd.f32 %v4937_v12, %v1408_v17  ;;  %v1453_v13 = vmax.f32 %v1417_v60, 0.0 }
 0x271   : > { %v3817_v35 = vpop.f32.mrf.mxu1 }
 0x272   : > { %v1420_v48 = vadd.f32 %v3817_v35, %v4937_v12  ;;  %v1451_v31 = vmax.f32 %v1409_v59, 0.0 }
 0x273   : > { %v1411_v38 = vpop.f32.mrf.mxu1 }
 0x274   : > { %v1412_v44 = vadd.f32 %v4937_v12, %v1411_v38  ;;  %v1454_v25 = vmax.f32 %v1420_v48, 0.0 }
 0x276   : > { %v1452_v27 = vmax.f32 %v1412_v44, 0.0  ;;  %v1470_v49 = vpack.c.bf16 %v1454_v25, %v1453_v13 }
 0x278   : > { %v1469_v16 = vpack.c.bf16 %v1452_v27, %v1451_v31 }
 0x27a   : > { %3862 = vmatprep.mubr.bf16.mxu0 %v1469_v16 }
 0x27b   : > { %3863 = vmatmul.mubr.bf16.gmra.mxu0 %v1470_v49 }
 0x2cb   : > { %v3836_v2 = vpop.f32.mrf.mxu0 }
 0x2cc   : > { %v1585_v12 = vadd.f32 %v3836_v2, %v4979_v51 }
 0x2cd   : > { %v1576_v17 = vpop.f32.mrf.mxu0 }
 0x2ce   : > { %v3485_v35 = vmul.f32 -1.442695, %v1585_v12  ;;  %v1577_v59 = vadd.f32 %v4979_v51, %v1576_v17 }
 0x2cf   : > { %v3837_v48 = vpop.f32.mrf.mxu0 }
 0x2d0   : > { %4134 = vpow2.f32 %v3485_v35  ;;  %v3483_v60 = vmul.f32 -1.442695, %v1577_v59  ;;  %v1588_v38 = vadd.f32 %v3837_v48, %v4979_v51 }
 0x2d1   : > { %v1579_v56 = vpop.f32.mrf.mxu0 }
 0x2d2   : > { %4136 = vpow2.f32 %v3483_v60  ;;  %v3486_v44 = vmul.f32 -1.442695, %v1588_v38  ;;  %v1580_v10 = vadd.f32 %v4979_v51, %v1579_v56 }
 0x2d4   : > { %4138 = vpow2.f32 %v3486_v44  ;;  %v3484_v25 = vmul.f32 -1.442695, %v1580_v10 }
 0x2d6   : > { %4140 = vpow2.f32 %v3484_v25 }
 0x2db   : > { %v3840_v31 = vpop.f32.mrf.mxu0 }
 0x2dc   : > { %v1601_v27 = vadd.f32 %v3840_v31, %v4979_v51 }
 0x2dd   : > { %v4135_v13 = vpop.eup %4134  ;;  %v1592_v16 = vpop.f32.mrf.mxu0 }
 0x2de   : > { %v1801_v49 = vadd.f32 1.0, %v4135_v13  ;;  %v3489_v2 = vmul.f32 -1.442695, %v1601_v27  ;;  %v1593_v12 = vadd.f32 %v4979_v51, %v1592_v16 }
 0x2df   : > { %v4137_v17 = vpop.eup %4136  ;;  %v3841_v35 = vpop.f32.mrf.mxu0 }
 0x2e0   : > { %4142 = vrcp.f32 %v1801_v49  ;;  %v1799_v59 = vadd.f32 1.0, %v4137_v17  ;;  %v3487_v48 = vmul.f32 -1.442695, %v1593_v12  ;;  %v1604_v60 = vadd.f32 %v3841_v35, %v4979_v51 }
 0x2e1   : > { %v4139_v38 = vpop.eup %4138  ;;  %4144 = vpow2.f32 %v3489_v2  ;;  %v1595_v56 = vpop.f32.mrf.mxu0 }
 0x2e2   : > { %4146 = vrcp.f32 %v1799_v59  ;;  %v1802_v44 = vadd.f32 1.0, %v4139_v38  ;;  %v3490_v10 = vmul.f32 -1.442695, %v1604_v60  ;;  %v1596_v25 = vadd.f32 %v4979_v51, %v1595_v56 }
 0x2e3   : > { %v4141_v31 = vpop.eup %4140  ;;  %4148 = vpow2.f32 %v3487_v48 }
 0x2e4   : > { %4150 = vrcp.f32 %v1802_v44  ;;  %v1800_v27 = vadd.f32 1.0, %v4141_v31  ;;  %v3488_v13 = vmul.f32 -1.442695, %v1596_v25 }
 0x2e5   : > { %4152 = vpow2.f32 %v3490_v10 }
 0x2e6   : > { %4154 = vrcp.f32 %v1800_v27 }
 0x2e7   : > { %4156 = vpow2.f32 %v3488_v13 }
 0x2eb   : > { %v3844_v16 = vpop.f32.mrf.mxu0 }
 0x2ec   : > { %v1617_v49 = vadd.f32 %v3844_v16, %v4979_v51 }
 0x2ed   : > { %v4143_v12 = vpop.eup %4142  ;;  %v1608_v17 = vpop.f32.mrf.mxu0 }
 0x2ee   : > { %v4145_v2 = vpop.eup %4144  ;;  %v3493_v35 = vmul.f32 -1.442695, %v1617_v49  ;;  %v1609_v59 = vadd.f32 %v4979_v51, %v1608_v17  ;;  %2981 = vrot.lane.b32.xlu1 %v4143_v12, %s4493_s26 }
 0x2ef   : > { %v4147_v60 = vpop.eup %4146  ;;  %v1805_v48 = vadd.f32 1.0, %v4145_v2  ;;  %v3845_v38 = vpop.f32.mrf.mxu0 }
 0x2f0   : > { %v4149_v56 = vpop.eup %4148  ;;  %4158 = vpow2.f32 %v3493_v35  ;;  %v3491_v44 = vmul.f32 -1.442695, %v1609_v59  ;;  %v1620_v10 = vadd.f32 %v3845_v38, %v4979_v51  ;;  %2977 = vrot.lane.b32.xlu0 %v4147_v60, %s4493_s26 }
 0x2f1   : > { %v4151_v25 = vpop.eup %4150  ;;  %4160 = vrcp.f32 %v1805_v48  ;;  %v1803_v31 = vadd.f32 1.0, %v4149_v56  ;;  %v1611_v27 = vpop.f32.mrf.mxu0 }
 0x2f2   : > { %v4153_v13 = vpop.eup %4152  ;;  %4162 = vpow2.f32 %v3491_v44  ;;  %v3494_v16 = vmul.f32 -1.442695, %v1620_v10  ;;  %v1612_v49 = vadd.f32 %v4979_v51, %v1611_v27  ;;  %2983 = vrot.lane.b32.xlu1 %v4151_v25, %s4493_s26  ;;  %v1933_v56 = vpack.c.bf16 %v4151_v25, %v4143_v12 }
 0x2f3   : > { %v4155_v17 = vpop.eup %4154  ;;  %4164 = vrcp.f32 %v1803_v31  ;;  %v1806_v2 = vadd.f32 1.0, %v4153_v13 }
 0x2f4   : > { %v4157_v35 = vpop.eup %4156  ;;  %4166 = vpow2.f32 %v3494_v16  ;;  %v3492_v59 = vmul.f32 -1.442695, %v1612_v49  ;;  %2979 = vrot.lane.b32.xlu0 %v4155_v17, %s4493_s26  ;;  %v1932_v38 = vpack.c.bf16 %v4155_v17, %v4147_v60 }
 0x2f5   : > { %4168 = vrcp.f32 %v1806_v2  ;;  %v1804_v48 = vadd.f32 1.0, %v4157_v35 }
 0x2f6   : > { %4170 = vpow2.f32 %v3492_v59  ;;  %3868 = vmatprep.mubr.msk.bf16.mxu1 %vm1949_vm1, %v1932_v38 }
 0x2f7   : > { %4172 = vrcp.f32 %v1804_v48  ;;  %3869 = vmatmul.mubr.msk.bf16.vlgmr.msra.gmra.mxu1 %vm1949_vm1, %v1933_v56 }
 0x2fb   : > { %v3848_v44 = vpop.f32.mrf.mxu0 }
 0x2fc   : > { %v1633_v10 = vadd.f32 %v3848_v44, %v4979_v51 }
 0x2fd   : > { %v4159_v31 = vpop.eup %4158  ;;  %v1624_v27 = vpop.f32.mrf.mxu0 }
 0x2fe   : > { %v4161_v13 = vpop.eup %4160  ;;  %v1809_v16 = vadd.f32 1.0, %v4159_v31  ;;  %v3497_v49 = vmul.f32 -1.442695, %v1633_v10  ;;  %v1625_v21 = vadd.f32 %v4979_v51, %v1624_v27 }
 0x2ff   : > { %v4163_v60 = vpop.eup %4162  ;;  %2989 = vrot.lane.b32.xlu0 %v4161_v13, %s4493_s26  ;;  %v3849_v12 = vpop.f32.mrf.mxu0 }
 0x300   : > { %v4165_v25 = vpop.eup %4164  ;;  %4174 = vrcp.f32 %v1809_v16  ;;  %v1807_v17 = vadd.f32 1.0, %v4163_v60  ;;  %v3495_v2 = vmul.f32 -1.442695, %v1625_v21  ;;  %v1636_v35 = vadd.f32 %v3849_v12, %v4979_v51 }
 0x301   : > { %v4167_v59 = vpop.eup %4166  ;;  %4176 = vpow2.f32 %v3497_v49  ;;  %v1627_v38 = vpop.f32.mrf.mxu0 }
 0x302   : > { %v4169_v48 = vpop.eup %4168  ;;  %4178 = vrcp.f32 %v1807_v17  ;;  %v1810_v56 = vadd.f32 1.0, %v4167_v59  ;;  %v3498_v44 = vmul.f32 -1.442695, %v1636_v35  ;;  %v1628_v10 = vadd.f32 %v4979_v51, %v1627_v38 }
 0x303   : > { %v4171_v31 = vpop.eup %4170  ;;  %4180 = vpow2.f32 %v3495_v2  ;;  %2991 = vrot.lane.b32.xlu1 %v4169_v48, %s4493_s26  ;;  %2985 = vrot.lane.b32.xlu0 %v4165_v25, %s4493_s26  ;;  %v1935_v49 = vpack.c.bf16 %v4169_v48, %v4161_v13 }
 0x304   : > { %v4173_v27 = vpop.eup %4172  ;;  %4182 = vrcp.f32 %v1810_v56  ;;  %v1808_v21 = vadd.f32 1.0, %v4171_v31  ;;  %v3496_v16 = vmul.f32 -1.442695, %v1628_v10 }
 0x305   : > { %4184 = vpow2.f32 %v3498_v44  ;;  %v1934_v60 = vpack.c.bf16 %v4173_v27, %v4165_v25 }
 0x306   : > { %4186 = vrcp.f32 %v1808_v21 }
 0x307   : > { %4188 = vpow2.f32 %v3496_v16  ;;  %2987 = vrot.lane.b32.xlu1 %v4173_v27, %s4493_s26  ;;  %3872 = vmatprep.mubr.msk.bf16.mxu1 %vm1949_vm1, %v1934_v60 }
 0x308   : > { %3873 = vmatmul.mubr.msk.bf16.gmra.mxu1 %vm1949_vm1, %v1935_v49 }
 0x30b   : > { %v3852_v12 = vpop.f32.mrf.mxu0 }
 0x30c   : > { %v1649_v17 = vadd.f32 %v3852_v12, %v4979_v51 }
 0x30d   : > { %v4175_v2 = vpop.eup %4174  ;;  %v1640_v35 = vpop.f32.mrf.mxu0 }
 0x30e   : > { %v4177_v59 = vpop.eup %4176  ;;  %v3501_v38 = vmul.f32 -1.442695, %v1649_v17  ;;  %v1641_v56 = vadd.f32 %v4979_v51, %v1640_v35  ;;  %2997 = vrot.lane.b32.xlu0 %v4175_v2, %s4493_s26 }
 0x30f   : > { %v4179_v25 = vpop.eup %4178  ;;  %v1813_v13 = vadd.f32 1.0, %v4177_v59  ;;  %v3853_v48 = vpop.f32.mrf.mxu0 }
 0x310   : > { %v4181_v44 = vpop.eup %4180  ;;  %4190 = vpow2.f32 %v3501_v38  ;;  %v3499_v10 = vmul.f32 -1.442695, %v1641_v56  ;;  %v1652_v31 = vadd.f32 %v3853_v48, %v4979_v51 }
 0x311   : > { %v4183_v27 = vpop.eup %4182  ;;  %4192 = vrcp.f32 %v1813_v13  ;;  %v1811_v21 = vadd.f32 1.0, %v4181_v44  ;;  %v1643_v16 = vpop.f32.mrf.mxu0 }
 0x312   : > { %v4185_v60 = vpop.eup %4184  ;;  %4194 = vpow2.f32 %v3499_v10  ;;  %v3502_v49 = vmul.f32 -1.442695, %v1652_v31  ;;  %v1644_v12 = vadd.f32 %v4979_v51, %v1643_v16  ;;  %2999 = vrot.lane.b32.xlu1 %v4183_v27, %s4493_s26  ;;  %2993 = vrot.lane.b32.xlu0 %v4179_v25, %s4493_s26  ;;  %v1937_v48 = vpack.c.bf16 %v4183_v27, %v4175_v2 }
 0x313   : > { %v4187_v17 = vpop.eup %4186  ;;  %4196 = vrcp.f32 %v1811_v21  ;;  %v1814_v35 = vadd.f32 1.0, %v4185_v60 }
 0x314   : > { %v4189_v59 = vpop.eup %4188  ;;  %4198 = vpow2.f32 %v3502_v49  ;;  %v3500_v38 = vmul.f32 -1.442695, %v1644_v12  ;;  %v1936_v56 = vpack.c.bf16 %v4187_v17, %v4179_v25 }
 0x315   : > { %4200 = vrcp.f32 %v1814_v35  ;;  %v1812_v13 = vadd.f32 1.0, %v4189_v59 }
 0x316   : > { %4202 = vpow2.f32 %v3500_v38  ;;  %2995 = vrot.lane.b32.xlu1 %v4187_v17, %s4493_s26  ;;  %3876 = vmatprep.mubr.msk.bf16.mxu1 %vm1949_vm1, %v1936_v56 }
 0x317   : > { %4204 = vrcp.f32 %v1812_v13  ;;  %3877 = vmatmul.mubr.msk.bf16.gmra.mxu1 %vm1949_vm1, %v1937_v48 }
 0x31b   : > { %v3856_v44 = vpop.f32.mrf.mxu0 }
 0x31c   : > { %v1665_v10 = vadd.f32 %v3856_v44, %v4979_v51 }
 0x31d   : > { %v4191_v31 = vpop.eup %4190  ;;  %v1656_v21 = vpop.f32.mrf.mxu0 }
 0x31e   : > { %v4193_v16 = vpop.eup %4192  ;;  %v1817_v60 = vadd.f32 1.0, %v4191_v31  ;;  %v3505_v49 = vmul.f32 -1.442695, %v1665_v10  ;;  %v1657_v25 = vadd.f32 %v4979_v51, %v1656_v21 }
 0x31f   : > { %v4195_v12 = vpop.eup %4194  ;;  %3005 = vrot.lane.b32.xlu0 %v4193_v16, %s4493_s26  ;;  %v3857_v2 = vpop.f32.mrf.mxu0 }
 0x320   : > { %v4197_v27 = vpop.eup %4196  ;;  %4206 = vrcp.f32 %v1817_v60  ;;  %v1815_v17 = vadd.f32 1.0, %v4195_v12  ;;  %v3503_v35 = vmul.f32 -1.442695, %v1657_v25  ;;  %v1668_v59 = vadd.f32 %v3857_v2, %v4979_v51 }
 0x321   : > { %v4199_v38 = vpop.eup %4198  ;;  %4208 = vpow2.f32 %v3505_v49  ;;  %v1659_v56 = vpop.f32.mrf.mxu0  ;;  %v4118_v49 = vld [vmem:[%s5609_s5 + $0x38] sm:$0xff]  }
 0x322   : > { %v4201_v13 = vpop.eup %4200  ;;  %4210 = vrcp.f32 %v1815_v17  ;;  %v1818_v48 = vadd.f32 1.0, %v4199_v38  ;;  %v3506_v44 = vmul.f32 -1.442695, %v1668_v59  ;;  %v1660_v10 = vadd.f32 %v4979_v51, %v1659_v56  ;;  %3900 = vmatprep.subr.bf16.mxu0 %v4118_v49  ;;  %v4119_v17 = vld [vmem:[%s5609_s5 + $0x30] sm:$0xff]  }
 0x323   : > { %v4203_v31 = vpop.eup %4202  ;;  %4212 = vpow2.f32 %v3503_v35  ;;  %3007 = vrot.lane.b32.xlu1 %v4201_v13, %s4493_s26  ;;  %3001 = vrot.lane.b32.xlu0 %v4197_v27, %s4493_s26  ;;  %v1939_v2 = vpack.c.bf16 %v4201_v13, %v4193_v16  ;;  %v4120_v35 = vld [vmem:[%s5609_s5 + $0x28] sm:$0xff]  }
 0x324   : > { %v4205_v21 = vpop.eup %4204  ;;  %4214 = vrcp.f32 %v1818_v48  ;;  %v1816_v60 = vadd.f32 1.0, %v4203_v31  ;;  %v3504_v25 = vmul.f32 -1.442695, %v1660_v10  ;;  %3901 = vmatpush3.bf16.msra.mxu0 %v4118_v49  ;;  %v4121_v49 = vld [vmem:[%s5609_s5 + $0x20] sm:$0xff]  }
 0x325   : > { %4216 = vpow2.f32 %v3506_v44  ;;  %v1938_v12 = vpack.c.bf16 %v4205_v21, %v4197_v27  ;;  %3902 = vmatprep.subr.bf16.mxu0 %v4119_v17 }
 0x326   : > { %4218 = vrcp.f32 %v1816_v60 }
 0x327   : > { %4220 = vpow2.f32 %v3504_v25  ;;  %3003 = vrot.lane.b32.xlu1 %v4205_v21, %s4493_s26  ;;  %3880 = vmatprep.mubr.msk.bf16.mxu1 %vm1949_vm1, %v1938_v12 }
 0x328   : > { %3881 = vmatmul.mubr.msk.bf16.gmra.mxu1 %vm1949_vm1, %v1939_v2  ;;  %3903 = vmatpush3.bf16.msra.mxu0 %v4119_v17 }
 0x329   : > { %3904 = vmatprep.subr.bf16.mxu0 %v4120_v35 }
 0x32b   : > { %v3860_v27 = vpop.f32.mrf.mxu0 }
 0x32c   : > { %v1681_v16 = vadd.f32 %v3860_v27, %v4979_v51  ;;  %3905 = vmatpush3.bf16.msra.mxu0 %v4120_v35 }
 0x32d   : > { %v4207_v59 = vpop.eup %4206  ;;  %v1672_v38 = vpop.f32.mrf.mxu0  ;;  %3906 = vmatprep.subr.bf16.mxu0 %v4121_v49 }
 0x32e   : > { %v4209_v56 = vpop.eup %4208  ;;  %v3509_v13 = vmul.f32 -1.442695, %v1681_v16  ;;  %v1673_v48 = vadd.f32 %v4979_v51, %v1672_v38  ;;  %3013 = vrot.lane.b32.xlu0 %v4207_v59, %s4493_s26 }
 0x32f   : > { %v4211_v44 = vpop.eup %4210  ;;  %v1821_v10 = vadd.f32 1.0, %v4209_v56  ;;  %v3861_v31 = vpop.f32.mrf.mxu0 }
 0x330   : > { %v4213_v21 = vpop.eup %4212  ;;  %4222 = vpow2.f32 %v3509_v13  ;;  %v3507_v60 = vmul.f32 -1.442695, %v1673_v48  ;;  %v1684_v25 = vadd.f32 %v3861_v31, %v4979_v51  ;;  %3907 = vmatpush3.bf16.msra.mxu0 %v4121_v49 }
 0x331   : > { %v4215_v12 = vpop.eup %4214  ;;  %4224 = vrcp.f32 %v1821_v10  ;;  %v1819_v2 = vadd.f32 1.0, %v4213_v21  ;;  %v1675_v17 = vpop.f32.mrf.mxu0  ;;  %v4122_v10 = vld [vmem:[%s5609_s5 + $0x18] sm:$0xff]  }
 0x332   : > { %v4217_v27 = vpop.eup %4216  ;;  %4226 = vpow2.f32 %v3507_v60  ;;  %v3510_v16 = vmul.f32 -1.442695, %v1684_v25  ;;  %v1676_v38 = vadd.f32 %v4979_v51, %v1675_v17  ;;  %3015 = vrot.lane.b32.xlu1 %v4215_v12, %s4493_s26  ;;  %3009 = vrot.lane.b32.xlu0 %v4211_v44, %s4493_s26  ;;  %v1941_v60 = vpack.c.bf16 %v4215_v12, %v4207_v59  ;;  %v4124_v59 = vld [vmem:[%s5609_s5 + $0x8] sm:$0xff]  }
 0x333   : > { %v4219_v56 = vpop.eup %4218  ;;  %4228 = vrcp.f32 %v1819_v2  ;;  %v1822_v35 = vadd.f32 1.0, %v4217_v27  ;;  %3908 = vmatprep.subr.bf16.mxu0 %v4122_v10 }
 0x334   : > { %v4221_v13 = vpop.eup %4220  ;;  %4230 = vpow2.f32 %v3510_v16  ;;  %v3508_v48 = vmul.f32 -1.442695, %v1676_v38  ;;  %v1940_v31 = vpack.c.bf16 %v4219_v56, %v4211_v44  ;;  %3909 = vmatpush3.bf16.msra.mxu0 %v4122_v10  ;;  %v4123_v44 = vld [vmem:[%s5609_s5 + $0x10] sm:$0xff]  }
 0x335   : > { %4232 = vrcp.f32 %v1822_v35  ;;  %v1820_v21 = vadd.f32 1.0, %v4221_v13  ;;  %3910 = vmatprep.subr.bf16.mxu0 %v4123_v44 }
 0x336   : > { %4234 = vpow2.f32 %v3508_v48  ;;  %3011 = vrot.lane.b32.xlu1 %v4219_v56, %s4493_s26  ;;  %3884 = vmatprep.mubr.msk.bf16.mxu1 %vm1949_vm1, %v1940_v31 }
 0x337   : > { %4236 = vrcp.f32 %v1820_v21  ;;  %3885 = vmatmul.mubr.msk.bf16.gmra.mxu1 %vm1949_vm1, %v1941_v60  ;;  %v4125_v21 = vld [vmem:[%s5609_s5] sm:$0xff]  }
 0x338   : > { %3911 = vmatpush3.bf16.msra.mxu0 %v4123_v44 }
 0x339   : > { %3912 = vmatprep.subr.bf16.mxu0 %v4124_v59 }
 0x33b   : > { %v3864_v25 = vpop.f32.mrf.mxu0 }
 0x33c   : > { %v1697_v49 = vadd.f32 %v3864_v25, %v4979_v51  ;;  %3913 = vmatpush3.bf16.msra.mxu0 %v4124_v59 }
 0x33d   : > { %v4223_v12 = vpop.eup %4222  ;;  %v1688_v2 = vpop.f32.mrf.mxu0  ;;  %3914 = vmatprep.subr.bf16.mxu0 %v4125_v21 }
 0x33e   : > { %v4225_v17 = vpop.eup %4224  ;;  %v1825_v27 = vadd.f32 1.0, %v4223_v12  ;;  %v3513_v16 = vmul.f32 -1.442695, %v1697_v49  ;;  %v1689_v38 = vadd.f32 %v4979_v51, %v1688_v2 }
 0x33f   : > { %v4227_v56 = vpop.eup %4226  ;;  %3021 = vrot.lane.b32.xlu0 %v4225_v17, %s4493_s26  ;;  %v3865_v35 = vpop.f32.mrf.mxu0 }
 0x340   : > { %v4229_v13 = vpop.eup %4228  ;;  %4238 = vrcp.f32 %v1825_v27  ;;  %v1823_v48 = vadd.f32 1.0, %v4227_v56  ;;  %v3511_v31 = vmul.f32 -1.442695, %v1689_v38  ;;  %v1700_v10 = vadd.f32 %v3865_v35, %v4979_v51  ;;  %3915 = vmatpush3.bf16.msra.mxu0 %v4125_v21 }
 0x341   : > { %v4231_v60 = vpop.eup %4230  ;;  %4240 = vpow2.f32 %v3513_v16  ;;  %v1691_v44 = vpop.f32.mrf.mxu0 }
 0x342   : > { %v4233_v25 = vpop.eup %4232  ;;  %4242 = vrcp.f32 %v1823_v48  ;;  %v1826_v49 = vadd.f32 1.0, %v4231_v60  ;;  %v3514_v12 = vmul.f32 -1.442695, %v1700_v10  ;;  %v1692_v2 = vadd.f32 %v4979_v51, %v1691_v44 }
 0x343   : > { %v4235_v27 = vpop.eup %4234  ;;  %4244 = vpow2.f32 %v3511_v31  ;;  %3023 = vrot.lane.b32.xlu1 %v4233_v25, %s4493_s26  ;;  %3017 = vrot.lane.b32.xlu0 %v4229_v13, %s4493_s26  ;;  %v1943_v35 = vpack.c.bf16 %v4233_v25, %v4225_v17 }
 0x344   : > { %v4237_v59 = vpop.eup %4236  ;;  %4246 = vrcp.f32 %v1826_v49  ;;  %v1824_v38 = vadd.f32 1.0, %v4235_v27  ;;  %v3512_v56 = vmul.f32 -1.442695, %v1692_v2 }
 0x345   : > { %4248 = vpow2.f32 %v3514_v12  ;;  %v1942_v16 = vpack.c.bf16 %v4237_v59, %v4229_v13 }
 0x346   : > { %4250 = vrcp.f32 %v1824_v38 }
 0x347   : > { %4252 = vpow2.f32 %v3512_v56  ;;  %3019 = vrot.lane.b32.xlu1 %v4237_v59, %s4493_s26  ;;  %3888 = vmatprep.mubr.msk.bf16.mxu1 %vm1949_vm1, %v1942_v16  ;;  %v4390_v56 = vld [vmem:[%s5612_s8] ss:$0 sm:$0xff] }
 0x348   : > { %3889 = vmatmul.mubr.msk.bf16.gmra.mxu1 %vm1949_vm1, %v1943_v35  ;;  %v1145_v16 = vadd.f32 %v4390_v56, %v4770_v24 }
 0x34d   : > { %v4239_v51 = vpop.eup %4238 }
 0x34e   : > { %v4241_v48 = vpop.eup %4240  ;;  %3029 = vrot.lane.b32.xlu0 %v4239_v51, %s4493_s26 }
 0x34f   : > { %v4243_v31 = vpop.eup %4242  ;;  %v1829_v10 = vadd.f32 1.0, %v4241_v48 }
 0x350   : > { %v4245_v60 = vpop.eup %4244 }
 0x351   : > { %v4247_v44 = vpop.eup %4246  ;;  %4254 = vrcp.f32 %v1829_v10  ;;  %v1827_v21 = vadd.f32 1.0, %v4245_v60 }
 0x352   : > { %v4249_v13 = vpop.eup %4248  ;;  %3031 = vrot.lane.b32.xlu1 %v4247_v44, %s4493_s26  ;;  %3025 = vrot.lane.b32.xlu0 %v4243_v31, %s4493_s26  ;;  %v1945_v27 = vpack.c.bf16 %v4247_v44, %v4239_v51 }
 0x353   : > { %v4251_v17 = vpop.eup %4250  ;;  %v1830_v25 = vadd.f32 1.0, %v4249_v13  ;;  %4256 = vrcp.f32 %v1827_v21  ;;  %v1151_v21 = vadd.f32 %v4390_v56, %v4781_v34  ;;  %v1155_v34 = vadd.f32 %v4390_v56, %v4795_v47 }
 0x354   : > { %v4253_v49 = vpop.eup %4252  ;;  %v1944_v12 = vpack.c.bf16 %v4251_v17, %v4243_v31  ;;  %v1159_v47 = vadd.f32 %v4390_v56, %v4809_v63 }
 0x355   : > { %4258 = vrcp.f32 %v1830_v25  ;;  %v1828_v2 = vadd.f32 1.0, %v4253_v49  ;;  %v1149_v49 = vadd.f32 %v4390_v56, %v4784_v37  ;;  %v1153_v37 = vadd.f32 %v4390_v56, %v4798_v50 }
 0x356   : > { %3027 = vrot.lane.b32.xlu1 %v4251_v17, %s4493_s26  ;;  %3892 = vmatprep.mubr.msk.bf16.mxu1 %vm1949_vm1, %v1944_v12  ;;  %v1152_v12 = vadd.f32 %v4390_v56, %v4789_v40  ;;  %v1156_v40 = vadd.f32 %v4390_v56, %v4803_v55  ;;  %v1157_v50 = vadd.f32 %v4390_v56, %v4812_v3 }
 0x357   : > { %4260 = vrcp.f32 %v1828_v2  ;;  %3893 = vmatmul.mubr.msk.bf16.gmra.mxu1 %vm1949_vm1, %v1945_v27  ;;  %v1160_v55 = vadd.f32 %v4390_v56, %v4817_v7 }
 0x35e   : > { %v4255_v59 = vpop.eup %4254 }
 0x35f   : > { %3037 = vrot.lane.b32.xlu0 %v4255_v59, %s4493_s26 }
 0x360   : > { %v4257_v38 = vpop.eup %4256  ;;  %v5092_v24 = vpop.permute.xlu1 %2981 }
 0x362   : > { %v4259_v35 = vpop.eup %4258  ;;  %v2978_v51 = vpop.permute.xlu0 %2977 }
 0x363   : > { %3039 = vrot.lane.b32.xlu1 %v4259_v35, %s4493_s26  ;;  %3033 = vrot.lane.b32.xlu0 %v4257_v38, %s4493_s26  ;;  %v5087_v48 = vsel %vm3201_vm2, %v1145_v16, %v2978_v51  ;;  %v1947_v60 = vpack.c.bf16 %v4259_v35, %v4255_v59 }
 0x364   : > { %v4261_v31 = vpop.eup %4260  ;;  %v5097_v13 = vpop.permute.xlu1 %2983 }
 0x365   : > { %v1946_v10 = vpack.c.bf16 %v4261_v31, %v4257_v38 }
 0x366   : > { %v5094_v44 = vpop.permute.xlu0 %2979 }
 0x367   : > { %3035 = vrot.lane.b32.xlu1 %v4261_v31, %s4493_s26  ;;  %3896 = vmatprep.mubr.msk.bf16.mxu1 %vm1949_vm1, %v1946_v10 }
 0x368   : > { %3897 = vmatmul.mubr.msk.bf16.gmra.mxu1 %vm1949_vm1, %v1947_v60 }
 0x371   : > { %v2990_v17 = vpop.permute.xlu0 %2989 }
 0x372   : > { %v5100_v25 = vsel %vm3201_vm2, %v1151_v21, %v2990_v17 }
 0x375   : > { %v2992_v2 = vpop.permute.xlu1 %2991  ;;  %v2986_v27 = vpop.permute.xlu0 %2985 }
 0x376   : > { %v5105_v59 = vsel %vm3201_vm2, %v1152_v12, %v2992_v2  ;;  %v5108_v38 = vsel %vm3201_vm2, %v1149_v49, %v2986_v27 }
 0x379   : > { %v5111_v16 = vpop.permute.xlu1 %2987 }
 0x380   : > { %v2998_v35 = vpop.permute.xlu0 %2997 }
 0x381   : > { %v5114_v51 = vsel %vm3201_vm2, %v1155_v34, %v2998_v35 }
 0x384   : > { %v3000_v31 = vpop.permute.xlu1 %2999  ;;  %v2994_v10 = vpop.permute.xlu0 %2993 }
 0x385   : > { %v5119_v60 = vsel %vm3201_vm2, %v1156_v40, %v3000_v31  ;;  %v5122_v21 = vsel %vm3201_vm2, %v1153_v37, %v2994_v10 }
 0x388   : > { %v5125_v17 = vpop.permute.xlu1 %2995 }
 0x391   : > { %v3006_v49 = vpop.permute.xlu0 %3005 }
 0x392   : > { %v5128_v12 = vsel %vm3201_vm2, %v1159_v47, %v3006_v49 }
 0x395   : > { %v3008_v2 = vpop.permute.xlu1 %3007  ;;  %v3002_v27 = vpop.permute.xlu0 %3001 }
 0x396   : > { %v5133_v34 = vsel %vm3201_vm2, %v1160_v55, %v3008_v2  ;;  %v5136_v35 = vsel %vm3201_vm2, %v1157_v50, %v3002_v27  ;;  %v4127_v2 = vld [vmem:[%s5610_s6 + $0x30] sm:$0xff]  }
 0x399   : > { %v5138_v37 = vpop.permute.xlu1 %3003 }
 0x3a0   : > { %v3014_v63 = vpop.permute.xlu0 %3013 }
 0x3a1   : > { %v5142_v40 = vsel %vm3201_vm2, %v4830_v19, %v3014_v63 }
 0x3a4   : > { %v3016_v31 = vpop.permute.xlu1 %3015  ;;  %v3010_v10 = vpop.permute.xlu0 %3009 }
 0x3a5   : > { %v5146_v3 = vsel %vm3201_vm2, %v4839_v36, %v3016_v31  ;;  %v5150_v7 = vsel %vm3201_vm2, %v4834_v28, %v3010_v10 }
 0x3a6   : > { %5652 = vst [vmem:[#allocation29_spill] sm:$0xff] %v5150_v7 }
 0x3a8   : > { %v3012_v56 = vpop.permute.xlu1 %3011 }
 0x3a9   : > { %v5154_v47 = vsel %vm3201_vm2, %v4842_v43, %v3012_v56  ;;  %v4126_v43 = vld [vmem:[%s5610_s6 + $0x38] sm:$0xff]   ;;  %v4128_v56 = vld [vmem:[%s5610_s6 + $0x28] sm:$0xff]  }
 0x3aa   : > { %5653 = vst [vmem:[#allocation30_spill] sm:$0xff] %v5154_v47  ;;  %3948 = vmatprep.subr.bf16.mxu1 %v4126_v43 }
 0x3ab   : > { %3949 = vmatpush3.bf16.msra.mxu1 %v4126_v43 }
 0x3ac   : > { %3950 = vmatprep.subr.bf16.mxu1 %v4127_v2 }
 0x3af   : > { %3951 = vmatpush3.bf16.msra.mxu1 %v4127_v2  ;;  %v4130_v2 = vld [vmem:[%s5610_s6 + $0x18] sm:$0xff]  }
 0x3b0   : > { %3952 = vmatprep.subr.bf16.mxu1 %v4128_v56 }
 0x3b1   : > { %v3022_v49 = vpop.permute.xlu0 %3021 }
 0x3b2   : > { %v5158_v19 = vsel %vm3201_vm2, %v4848_v53, %v3022_v49  ;;  %v5177_v53 = vld [vmem:[%s5611_s7 + $0x2] ss:$0 sm:$0xff] }
 0x3b3   : > { %5654 = vst [vmem:[#allocation31_spill] sm:$0xff] %v5158_v19  ;;  %v1903_v31 = vadd.f32 %v5177_v53, %v4754_v5  ;;  %v1902_v49 = vadd.f32 %v5177_v53, %v4747_v0  ;;  %3953 = vmatpush3.bf16.msra.mxu1 %v4128_v56 }
 0x3b5   : > { %v3024_v50 = vpop.permute.xlu1 %3023  ;;  %v3018_v55 = vpop.permute.xlu0 %3017 }
 0x3b6   : > { %v5162_v36 = vsel %vm3201_vm2, %v4857_v9, %v3024_v50  ;;  %v5166_v28 = vsel %vm3201_vm2, %v4852_v61, %v3018_v55  ;;  %v1900_v61 = vadd.f32 %v5177_v53, %v4732_v52  ;;  %v1901_v55 = vadd.f32 %v5177_v53, %v4742_v58 }
 0x3b7   : > { %5655 = vst [vmem:[#allocation32_spill] sm:$0xff] %v5162_v36  ;;  %5656 = vst [vmem:[#allocation33_spill] sm:$0xff] %v5166_v28  ;;  %v3870_v27 = vpop.f32.mrf.mxu1 }
 0x3b8   : > { %v2165_v28 = vadd.f32 %v3870_v27, %v1902_v49  ;;  %v1905_v49 = vadd.f32 %v5177_v53, %v4763_v15 }
 0x3b9   : > { %v3020_v9 = vpop.permute.xlu1 %3019  ;;  %v2036_v63 = vpop.f32.mrf.mxu1 }
 0x3ba   : > { %v5185_v10 = vsel %vm3201_vm2, %v4860_v18, %v3020_v9  ;;  %v2163_v52 = vadd.f32 %v2036_v63, %v1900_v61  ;;  %v4129_v18 = vld [vmem:[%s5610_s6 + $0x20] sm:$0xff]   ;;  %v2197_v0 = vmax.f32 %v2165_v28, 0.0 }
 0x3bb   : > { %5657 = vst [vmem:[#allocation34_spill] sm:$0xff] %v5185_v10  ;;  %v3871_v50 = vpop.f32.mrf.mxu1  ;;  %3954 = vmatprep.subr.bf16.mxu1 %v4129_v18 }
 0x3bc   : > { %v2166_v43 = vadd.f32 %v3871_v50, %v1903_v31  ;;  %v2195_v10 = vmax.f32 %v2163_v52, 0.0  ;;  %3955 = vmatpush3.bf16.msra.mxu1 %v4129_v18 }
 0x3bd   : > { %v2039_v5 = vpop.f32.mrf.mxu1  ;;  %3956 = vmatprep.subr.bf16.mxu1 %v4130_v2 }
 0x3be   : > { %v2164_v36 = vadd.f32 %v2039_v5, %v1901_v55  ;;  %v2198_v9 = vmax.f32 %v2166_v43, 0.0 }
 0x3c0   : > { %v2196_v19 = vmax.f32 %v2164_v36, 0.0  ;;  %v3030_v47 = vpop.permute.xlu0 %3029  ;;  %v2228_v27 = vpack.c.bf16 %v2198_v9, %v2197_v0  ;;  %3957 = vmatpush3.bf16.msra.mxu1 %v4130_v2 }
 0x3c1   : > { %v5199_v7 = vsel %vm3201_vm2, %v4866_v30, %v3030_v47 }
 0x3c2   : > { %v2227_v58 = vpack.c.bf16 %v2196_v19, %v2195_v10  ;;  %v1904_v10 = vadd.f32 %v5177_v53, %v4759_v11 }
 0x3c4   : > { %v3032_v63 = vpop.permute.xlu1 %3031  ;;  %v3026_v61 = vpop.permute.xlu0 %3025  ;;  %3916 = vmatprep.mubr.bf16.mxu0 %v2227_v58 }
 0x3c5   : > { %v5206_v36 = vsel %vm3201_vm2, %v4875_v57, %v3032_v63  ;;  %v5210_v28 = vsel %vm3201_vm2, %v4870_v41, %v3026_v61  ;;  %3917 = vmatmul.mubr.bf16.vlgmr.msra.gmra.mxu0 %v2228_v27  ;;  %v1907_v57 = vadd.f32 %v5177_v53, %v4773_v26  ;;  %v1906_v41 = vadd.f32 %v5177_v53, %v4765_v20 }
 0x3c6   : > { %v1910_v63 = vadd.f32 %v5177_v53, %v4793_v46 }
 0x3c8   : > { %v3874_v30 = vpop.f32.mrf.mxu1  ;;  %v3028_v47 = vpop.permute.xlu1 %3027 }
 0x3c9   : > { %v5214_v19 = vsel %vm3201_vm2, %v4878_v8, %v3028_v47  ;;  %v2169_v52 = vadd.f32 %v3874_v30, %v1906_v41  ;;  %v1908_v30 = vadd.f32 %v5177_v53, %v4779_v33 }
 0x3ca   : > { %v2052_v31 = vpop.f32.mrf.mxu1 }
 0x3cb   : > { %v2167_v50 = vadd.f32 %v2052_v31, %v1904_v10  ;;  %v2201_v11 = vmax.f32 %v2169_v52, 0.0  ;;  %v1909_v10 = vadd.f32 %v5177_v53, %v4787_v39  ;;  %v1912_v39 = vadd.f32 %v5177_v53, %v4807_v62 }
 0x3cc   : > { %v3875_v56 = vpop.f32.mrf.mxu1 }
 0x3cd   : > { %v2170_v55 = vadd.f32 %v3875_v56, %v1907_v57  ;;  %v2199_v18 = vmax.f32 %v2167_v50, 0.0 }
 0x3ce   : > { %v2055_v8 = vpop.f32.mrf.mxu1 }
 0x3cf   : > { %v2168_v43 = vadd.f32 %v2055_v8, %v1905_v49  ;;  %v2202_v5 = vmax.f32 %v2170_v55, 0.0 }
 0x3d1   : > { %v2200_v9 = vmax.f32 %v2168_v43, 0.0  ;;  %v3038_v0 = vpop.permute.xlu0 %3037  ;;  %v2230_v20 = vpack.c.bf16 %v2202_v5, %v2201_v11  ;;  %v1915_v5 = vadd.f32 %v5177_v53, %v4836_v29  ;;  %v1918_v29 = vadd.f32 %v5177_v53, %v4862_v22 }
 0x3d2   : > { %v5226_v26 = vsel %vm3201_vm2, %v4884_v23, %v3038_v0  ;;  %v1911_v23 = vadd.f32 %v5177_v53, %v4801_v54  ;;  %v1914_v54 = vadd.f32 %v5177_v53, %v4821_v14  ;;  %v1913_v0 = vadd.f32 %v5177_v53, %v4815_v6 }
 0x3d3   : > { %v2229_v58 = vpack.c.bf16 %v2200_v9, %v2199_v18  ;;  %v1916_v6 = vadd.f32 %v5177_v53, %v4844_v45  ;;  %v4131_v45 = vld [vmem:[%s5610_s6 + $0x10] sm:$0xff]  }
 0x3d4   : > { %3958 = vmatprep.subr.bf16.mxu1 %v4131_v45 }
 0x3d5   : > { %v3040_v2 = vpop.permute.xlu1 %3039  ;;  %3920 = vmatprep.mubr.bf16.mxu0 %v2229_v58  ;;  %3959 = vmatpush3.bf16.msra.mxu1 %v4131_v45 }
 0x3d6   : > { %v5230_v15 = vsel %vm3201_vm2, %v4896_v4, %v3040_v2  ;;  %3921 = vmatmul.mubr.bf16.gmra.mxu0 %v2230_v20 }
 0x3d7   : > { %v3878_v27 = vpop.f32.mrf.mxu1 }
 0x3d8   : > { %v2173_v47 = vadd.f32 %v3878_v27, %v1910_v63 }
 0x3d9   : > { %v2068_v61 = vpop.f32.mrf.mxu1 }
 0x3da   : > { %v2171_v57 = vadd.f32 %v2068_v61, %v1908_v30  ;;  %v2205_v56 = vmax.f32 %v2173_v47, 0.0 }
 0x3db   : > { %v3879_v31 = vpop.f32.mrf.mxu1 }
 0x3dc   : > { %v2174_v4 = vadd.f32 %v3879_v31, %v1911_v23  ;;  %v2203_v55 = vmax.f32 %v2171_v57, 0.0  ;;  %v1919_v31 = vadd.f32 %v5177_v53, %v4872_v42 }
 0x3dd   : > { %v2071_v41 = vpop.f32.mrf.mxu1 }
 0x3de   : > { %v2206_v49 = vmax.f32 %v2174_v4, 0.0  ;;  %v2172_v50 = vadd.f32 %v2071_v41, %v1909_v10  ;;  %v1917_v4 = vadd.f32 %v5177_v53, %v4854_v1  ;;  %v1922_v1 = vadd.f32 %v5177_v53, %v4901_v32 }
 0x3e0   : > { %v2232_v46 = vpack.c.bf16 %v2206_v49, %v2205_v56  ;;  %v2204_v52 = vmax.f32 %v2172_v50, 0.0 }
 0x3e2   : > { %v2231_v8 = vpack.c.bf16 %v2204_v52, %v2203_v55 }
 0x3e4   : > { %3924 = vmatprep.mubr.bf16.mxu0 %v2231_v8 }
 0x3e5   : > { %3925 = vmatmul.mubr.bf16.gmra.mxu0 %v2232_v46 }
 0x3e8   : > { %v3882_v33 = vpop.f32.mrf.mxu1 }
 0x3e9   : > { %v2177_v18 = vadd.f32 %v3882_v33, %v1914_v54 }
 0x3ea   : > { %v2084_v43 = vpop.f32.mrf.mxu1 }
 0x3eb   : > { %v2175_v11 = vadd.f32 %v2084_v43, %v1912_v39  ;;  %v2209_v2 = vmax.f32 %v2177_v18, 0.0  ;;  %v4132_v43 = vld [vmem:[%s5610_s6 + $0x8] sm:$0xff]   ;;  %v5658_v39 = vld [vmem:[#allocation16_spill] sm:$0xff] }
 0x3ec   : > { %v3883_v9 = vpop.f32.mrf.mxu1  ;;  %v5659_v18 = vld [vmem:[#allocation19_spill] sm:$0xff]  ;;  %3960 = vmatprep.subr.bf16.mxu1 %v4132_v43 }
 0x3ed   : > { %v2178_v58 = vadd.f32 %v3883_v9, %v1915_v5  ;;  %v2207_v61 = vmax.f32 %v2175_v11, 0.0  ;;  %v1920_v5 = vadd.f32 %v5177_v53, %v5658_v39  ;;  %v1923_v9 = vadd.f32 %v5177_v53, %v5659_v18  ;;  %3961 = vmatpush3.bf16.msra.mxu1 %v4132_v43 }
 0x3ee   : > { %v2087_v20 = vpop.f32.mrf.mxu1 }
 0x3ef   : > { %v2210_v27 = vmax.f32 %v2178_v58, 0.0  ;;  %v2176_v63 = vadd.f32 %v2087_v20, %v1913_v0  ;;  %v5660_v58 = vld [vmem:[#allocation18_spill] sm:$0xff] }
 0x3f0   : > { %v1921_v20 = vadd.f32 %v5177_v53, %v5660_v58  ;;  %v5666_v58 = vld [vmem:[#allocation28_spill] sm:$0xff] }
 0x3f1   : > { %v2234_v14 = vpack.c.bf16 %v2210_v27, %v2209_v2  ;;  %v2208_v30 = vmax.f32 %v2176_v63, 0.0  ;;  %v4133_v63 = vld [vmem:[%s5610_s6] sm:$0xff]  }
 0x3f2   : > { %3962 = vmatprep.subr.bf16.mxu1 %v4133_v63 }
 0x3f3   : > { %v2233_v23 = vpack.c.bf16 %v2208_v30, %v2207_v61  ;;  %3963 = vmatpush3.bf16.msra.mxu1 %v4133_v63  ;;  %v5668_v63 = vld [vmem:[#allocation25_spill] sm:$0xff] }
 0x3f5   : > { %3928 = vmatprep.mubr.bf16.mxu0 %v2233_v23 }
 0x3f6   : > { %3929 = vmatmul.mubr.bf16.gmra.mxu0 %v2234_v14 }
 0x3f7   : > { %v3886_v62 = vpop.f32.mrf.mxu1 }
 0x3f8   : > { %v2181_v10 = vadd.f32 %v3886_v62, %v1918_v29 }
 0x3f9   : > { %v2100_v47 = vpop.f32.mrf.mxu1 }
 0x3fa   : > { %v2179_v41 = vadd.f32 %v2100_v47, %v1916_v6  ;;  %v2213_v50 = vmax.f32 %v2181_v10, 0.0 }
 0x3fb   : > { %v3887_v57 = vpop.f32.mrf.mxu1 }
 0x3fc   : > { %v2182_v56 = vadd.f32 %v3887_v57, %v1919_v31  ;;  %v2211_v52 = vmax.f32 %v2179_v41, 0.0  ;;  %v5661_v31 = vld [vmem:[#allocation22_spill] sm:$0xff] }
 0x3fd   : > { %v2103_v49 = vpop.f32.mrf.mxu1  ;;  %v1926_v10 = vadd.f32 %v5177_v53, %v5661_v31 }
 0x3fe   : > { %v2214_v55 = vmax.f32 %v2182_v56, 0.0  ;;  %v2180_v46 = vadd.f32 %v2103_v49, %v1917_v4  ;;  %v5662_v4 = vld [vmem:[#allocation20_spill] sm:$0xff]  ;;  %v5663_v56 = vld [vmem:[#allocation23_spill] sm:$0xff] }
 0x3ff   : > { %v1924_v41 = vadd.f32 %v5177_v53, %v5662_v4  ;;  %v1927_v49 = vadd.f32 %v5177_v53, %v5663_v56 }
 0x400   : > { %v2236_v22 = vpack.c.bf16 %v2214_v55, %v2213_v50  ;;  %v2212_v8 = vmax.f32 %v2180_v46, 0.0  ;;  %v5664_v46 = vld [vmem:[#allocation21_spill] sm:$0xff] }
 0x402   : > { %v2235_v33 = vpack.c.bf16 %v2212_v8, %v2211_v52  ;;  %v1925_v52 = vadd.f32 %v5177_v53, %v5664_v46 }
 0x404   : > { %3932 = vmatprep.mubr.bf16.mxu0 %v2235_v33 }
 0x405   : > { %3933 = vmatmul.mubr.bf16.gmra.mxu0 %v2236_v22 }
 0x408   : > { %v3890_v42 = vpop.f32.mrf.mxu1 }
 0x409   : > { %v2185_v0 = vadd.f32 %v3890_v42, %v1922_v1 }
 0x40a   : > { %v2116_v54 = vpop.f32.mrf.mxu1 }
 0x40b   : > { %v2183_v2 = vadd.f32 %v2116_v54, %v1920_v5  ;;  %v2217_v61 = vmax.f32 %v2185_v0, 0.0  ;;  %v5665_v0 = vld [vmem:[#allocation24_spill] sm:$0xff] }
 0x40c   : > { %v3891_v11 = vpop.f32.mrf.mxu1 }
 0x40d   : > { %v2186_v32 = vadd.f32 %v3891_v11, %v1923_v9  ;;  %v2215_v23 = vmax.f32 %v2183_v2, 0.0  ;;  %v1928_v11 = vadd.f32 %v5177_v53, %v5665_v0  ;;  %v5667_v2 = vld [vmem:[#allocation26_spill] sm:$0xff] }
 0x40e   : > { %v2119_v27 = vpop.f32.mrf.mxu1 }
 0x40f   : > { %v2218_v14 = vmax.f32 %v2186_v32, 0.0  ;;  %v2184_v30 = vadd.f32 %v2119_v27, %v1921_v20  ;;  %v1931_v20 = vadd.f32 %v5177_v53, %v5666_v58  ;;  %v1930_v32 = vadd.f32 %v5177_v53, %v5667_v2 }
 0x411   : > { %v2238_v62 = vpack.c.bf16 %v2218_v14, %v2217_v61  ;;  %v2216_v29 = vmax.f32 %v2184_v30, 0.0  ;;  %v1929_v61 = vadd.f32 %v5177_v53, %v5668_v63 }
 0x413   : > { %v2237_v47 = vpack.c.bf16 %v2216_v29, %v2215_v23 }
 0x415   : > { %3936 = vmatprep.mubr.bf16.mxu0 %v2237_v47 }
 0x416   : > { %3937 = vmatmul.mubr.bf16.gmra.mxu0 %v2238_v62 }
 0x417   : > { %v3894_v6 = vpop.f32.mrf.mxu1 }
 0x418   : > { %v2189_v50 = vadd.f32 %v3894_v6, %v1926_v10 }
 0x419   : > { %v2132_v57 = vpop.f32.mrf.mxu1 }
 0x41a   : > { %v2187_v22 = vadd.f32 %v2132_v57, %v1924_v41  ;;  %v2221_v45 = vmax.f32 %v2189_v50, 0.0 }
 0x41b   : > { %v3895_v55 = vpop.f32.mrf.mxu1 }
 0x41c   : > { %v2190_v8 = vadd.f32 %v3895_v55, %v1927_v49  ;;  %v2219_v54 = vmax.f32 %v2187_v22, 0.0  ;;  %v5292_v49 = vld [vmem:[%s5611_s7 + $0x3] ss:$0 sm:$0xff] }
 0x41d   : > { %v2135_v33 = vpop.f32.mrf.mxu1 }
 0x41e   : > { %v2222_v42 = vmax.f32 %v2190_v8, 0.0  ;;  %v2188_v1 = vadd.f32 %v2135_v33, %v1925_v52 }
 0x420   : > { %v2240_v43 = vpack.c.bf16 %v2222_v42, %v2221_v45  ;;  %v2220_v39 = vmax.f32 %v2188_v1, 0.0 }
 0x422   : > { %v2239_v5 = vpack.c.bf16 %v2220_v39, %v2219_v54 }
 0x424   : > { %3940 = vmatprep.mubr.bf16.mxu0 %v2239_v5 }
 0x425   : > { %3941 = vmatmul.mubr.bf16.gmra.mxu0 %v2240_v43 }
 0x428   : > { %v3898_v18 = vpop.f32.mrf.mxu1 }
 0x429   : > { %v2193_v23 = vadd.f32 %v3898_v18, %v1930_v32 }
 0x42a   : > { %v2148_v9 = vpop.f32.mrf.mxu1 }
 0x42b   : > { %v2191_v14 = vadd.f32 %v2148_v9, %v1928_v11  ;;  %v2225_v10 = vmax.f32 %v2193_v23, 0.0 }
 0x42c   : > { %v3899_v27 = vpop.f32.mrf.mxu1 }
 0x42d   : > { %v2194_v30 = vadd.f32 %v3899_v27, %v1931_v20  ;;  %v2223_v6 = vmax.f32 %v2191_v14, 0.0 }
 0x42e   : > { %v2151_v62 = vpop.f32.mrf.mxu1 }
 0x42f   : > { %v2192_v29 = vadd.f32 %v2151_v62, %v1929_v61  ;;  %v2226_v47 = vmax.f32 %v2194_v30, 0.0 }
 0x431   : > { %v2224_v31 = vmax.f32 %v2192_v29, 0.0  ;;  %v2242_v4 = vpack.c.bf16 %v2226_v47, %v2225_v10 }
 0x433   : > { %v2241_v57 = vpack.c.bf16 %v2224_v31, %v2223_v6 }
 0x435   : > { %3944 = vmatprep.mubr.bf16.mxu0 %v2241_v57 }
 0x436   : > { %3945 = vmatmul.mubr.bf16.gmra.mxu0 %v2242_v4 }
 0x485   : > { %v3918_v41 = vpop.f32.mrf.mxu0 }
 0x486   : > { %v2355_v46 = vadd.f32 %v3918_v41, %v5292_v49 }
 0x487   : > { %v2346_v56 = vpop.f32.mrf.mxu0 }
 0x488   : > { %v2347_v50 = vadd.f32 %v5292_v49, %v2346_v56  ;;  %v2475_v42 = vmax.f32 %v2355_v46, 0.0 }
 0x489   : > { %v3919_v53 = vpop.f32.mrf.mxu0 }
 0x48a   : > { %v2358_v55 = vadd.f32 %v3919_v53, %v5292_v49  ;;  %v2473_v33 = vmax.f32 %v2347_v50, 0.0 }
 0x48b   : > { %v2349_v52 = vpop.f32.mrf.mxu0 }
 0x48c   : > { %v2350_v22 = vadd.f32 %v5292_v49, %v2349_v52  ;;  %v2476_v8 = vmax.f32 %v2358_v55, 0.0 }
 0x48e   : > { %v2474_v45 = vmax.f32 %v2350_v22, 0.0  ;;  %v2506_v54 = vpack.c.bf16 %v2476_v8, %v2475_v42 }
 0x490   : > { %v2505_v1 = vpack.c.bf16 %v2474_v45, %v2473_v33 }
 0x492   : > { %3964 = vmatprep.mubr.bf16.mxu1 %v2505_v1 }
 0x493   : > { %3965 = vmatmul.mubr.bf16.vlgmr.msra.gmra.mxu1 %v2506_v54 }
 0x496   : > { %v3922_v43 = vpop.f32.mrf.mxu0 }
 0x497   : > { %v2371_v0 = vadd.f32 %v3922_v43, %v5292_v49 }
 0x498   : > { %v2362_v39 = vpop.f32.mrf.mxu0 }
 0x499   : > { %v2363_v18 = vadd.f32 %v5292_v49, %v2362_v39  ;;  %v2479_v27 = vmax.f32 %v2371_v0, 0.0 }
 0x49a   : > { %v3923_v5 = vpop.f32.mrf.mxu0 }
 0x49b   : > { %v2374_v9 = vadd.f32 %v3923_v5, %v5292_v49  ;;  %v2477_v2 = vmax.f32 %v2363_v18, 0.0 }
 0x49c   : > { %v2365_v11 = vpop.f32.mrf.mxu0 }
 0x49d   : > { %v2366_v58 = vadd.f32 %v5292_v49, %v2365_v11  ;;  %v2480_v20 = vmax.f32 %v2374_v9, 0.0 }
 0x49f   : > { %v2478_v32 = vmax.f32 %v2366_v58, 0.0  ;;  %v2508_v61 = vpack.c.bf16 %v2480_v20, %v2479_v27 }
 0x4a1   : > { %v2507_v63 = vpack.c.bf16 %v2478_v32, %v2477_v2 }
 0x4a3   : > { %3968 = vmatprep.mubr.bf16.mxu1 %v2507_v63 }
 0x4a4   : > { %3969 = vmatmul.mubr.bf16.gmra.mxu1 %v2508_v61 }
 0x4a5   : > { %v3926_v14 = vpop.f32.mrf.mxu0 }
 0x4a6   : > { %v2387_v47 = vadd.f32 %v3926_v14, %v5292_v49 }
 0x4a7   : > { %v2378_v30 = vpop.f32.mrf.mxu0 }
 0x4a8   : > { %v2379_v62 = vadd.f32 %v5292_v49, %v2378_v30  ;;  %v2483_v41 = vmax.f32 %v2387_v47, 0.0 }
 0x4a9   : > { %v3927_v23 = vpop.f32.mrf.mxu0 }
 0x4aa   : > { %v2390_v29 = vadd.f32 %v3927_v23, %v5292_v49  ;;  %v2481_v57 = vmax.f32 %v2379_v62, 0.0 }
 0x4ab   : > { %v2381_v6 = vpop.f32.mrf.mxu0 }
 0x4ac   : > { %v2382_v31 = vadd.f32 %v5292_v49, %v2381_v6  ;;  %v2484_v10 = vmax.f32 %v2390_v29, 0.0 }
 0x4ae   : > { %v2482_v4 = vmax.f32 %v2382_v31, 0.0  ;;  %v2510_v53 = vpack.c.bf16 %v2484_v10, %v2483_v41 }
 0x4b0   : > { %v2509_v56 = vpack.c.bf16 %v2482_v4, %v2481_v57 }
 0x4b2   : > { %3972 = vmatprep.mubr.bf16.mxu1 %v2509_v56 }
 0x4b3   : > { %3973 = vmatmul.mubr.bf16.gmra.mxu1 %v2510_v53 }
 0x4b6   : > { %v3930_v50 = vpop.f32.mrf.mxu0 }
 0x4b7   : > { %v2403_v8 = vadd.f32 %v3930_v50, %v5292_v49 }
 0x4b8   : > { %v2394_v55 = vpop.f32.mrf.mxu0 }
 0x4b9   : > { %v2395_v52 = vadd.f32 %v5292_v49, %v2394_v55  ;;  %v2487_v43 = vmax.f32 %v2403_v8, 0.0 }
 0x4ba   : > { %v3931_v46 = vpop.f32.mrf.mxu0 }
 0x4bb   : > { %v2406_v22 = vadd.f32 %v3931_v46, %v5292_v49  ;;  %v2485_v1 = vmax.f32 %v2395_v52, 0.0 }
 0x4bc   : > { %v2397_v33 = vpop.f32.mrf.mxu0 }
 0x4bd   : > { %v2398_v45 = vadd.f32 %v5292_v49, %v2397_v33  ;;  %v2488_v42 = vmax.f32 %v2406_v22, 0.0 }
 0x4bf   : > { %v2486_v54 = vmax.f32 %v2398_v45, 0.0  ;;  %v2512_v5 = vpack.c.bf16 %v2488_v42, %v2487_v43 }
 0x4c1   : > { %v2511_v39 = vpack.c.bf16 %v2486_v54, %v2485_v1 }
 0x4c3   : > { %3976 = vmatprep.mubr.bf16.mxu1 %v2511_v39 }
 0x4c4   : > { %3977 = vmatmul.mubr.bf16.gmra.mxu1 %v2512_v5 }
 0x4c5   : > { %v3934_v18 = vpop.f32.mrf.mxu0 }
 0x4c6   : > { %v2419_v20 = vadd.f32 %v3934_v18, %v5292_v49 }
 0x4c7   : > { %v2410_v9 = vpop.f32.mrf.mxu0 }
 0x4c8   : > { %v2411_v11 = vadd.f32 %v5292_v49, %v2410_v9  ;;  %v2491_v14 = vmax.f32 %v2419_v20, 0.0 }
 0x4c9   : > { %v3935_v0 = vpop.f32.mrf.mxu0 }
 0x4ca   : > { %v2422_v58 = vadd.f32 %v3935_v0, %v5292_v49  ;;  %v2489_v63 = vmax.f32 %v2411_v11, 0.0 }
 0x4cb   : > { %v2413_v2 = vpop.f32.mrf.mxu0 }
 0x4cc   : > { %v2414_v32 = vadd.f32 %v5292_v49, %v2413_v2  ;;  %v2492_v27 = vmax.f32 %v2422_v58, 0.0 }
 0x4ce   : > { %v2490_v61 = vmax.f32 %v2414_v32, 0.0  ;;  %v2514_v23 = vpack.c.bf16 %v2492_v27, %v2491_v14 }
 0x4d0   : > { %v2513_v30 = vpack.c.bf16 %v2490_v61, %v2489_v63 }
 0x4d2   : > { %3980 = vmatprep.mubr.bf16.mxu1 %v2513_v30 }
 0x4d3   : > { %3981 = vmatmul.mubr.bf16.gmra.mxu1 %v2514_v23 }
 0x4d6   : > { %v3938_v62 = vpop.f32.mrf.mxu0 }
 0x4d7   : > { %v2435_v10 = vadd.f32 %v3938_v62, %v5292_v49 }
 0x4d8   : > { %v2426_v29 = vpop.f32.mrf.mxu0 }
 0x4d9   : > { %v2427_v6 = vadd.f32 %v5292_v49, %v2426_v29  ;;  %v2495_v50 = vmax.f32 %v2435_v10, 0.0 }
 0x4da   : > { %v3939_v47 = vpop.f32.mrf.mxu0 }
 0x4db   : > { %v2438_v31 = vadd.f32 %v3939_v47, %v5292_v49  ;;  %v2493_v56 = vmax.f32 %v2427_v6, 0.0  ;;  %v5326_v6 = vld [vmem:[#allocation2] ss:$0 sm:$0xff] }
 0x4dc   : > { %v2429_v57 = vpop.f32.mrf.mxu0 }
 0x4dd   : > { %v2430_v4 = vadd.f32 %v5292_v49, %v2429_v57  ;;  %v2496_v41 = vmax.f32 %v2438_v31, 0.0 }
 0x4df   : > { %v2494_v53 = vmax.f32 %v2430_v4, 0.0  ;;  %v2516_v46 = vpack.c.bf16 %v2496_v41, %v2495_v50 }
 0x4e1   : > { %v2515_v55 = vpack.c.bf16 %v2494_v53, %v2493_v56 }
 0x4e3   : > { %3984 = vmatprep.mubr.bf16.mxu1 %v2515_v55 }
 0x4e4   : > { %3985 = vmatmul.mubr.bf16.gmra.mxu1 %v2516_v46 }
 0x4e5   : > { %v3942_v52 = vpop.f32.mrf.mxu0 }
 0x4e6   : > { %v2451_v42 = vadd.f32 %v3942_v52, %v5292_v49 }
 0x4e7   : > { %v2442_v22 = vpop.f32.mrf.mxu0 }
 0x4e8   : > { %v2443_v33 = vadd.f32 %v5292_v49, %v2442_v22  ;;  %v2499_v18 = vmax.f32 %v2451_v42, 0.0 }
 0x4e9   : > { %v3943_v8 = vpop.f32.mrf.mxu0 }
 0x4ea   : > { %v2454_v45 = vadd.f32 %v3943_v8, %v5292_v49  ;;  %v2497_v39 = vmax.f32 %v2443_v33, 0.0 }
 0x4eb   : > { %v2445_v1 = vpop.f32.mrf.mxu0 }
 0x4ec   : > { %v2446_v54 = vadd.f32 %v5292_v49, %v2445_v1  ;;  %v2500_v43 = vmax.f32 %v2454_v45, 0.0 }
 0x4ee   : > { %v2498_v5 = vmax.f32 %v2446_v54, 0.0  ;;  %v2518_v0 = vpack.c.bf16 %v2500_v43, %v2499_v18 }
 0x4f0   : > { %v2517_v9 = vpack.c.bf16 %v2498_v5, %v2497_v39 }
 0x4f2   : > { %3988 = vmatprep.mubr.bf16.mxu1 %v2517_v9 }
 0x4f3   : > { %3989 = vmatmul.mubr.bf16.gmra.mxu1 %v2518_v0 }
 0x4f6   : > { %v3946_v11 = vpop.f32.mrf.mxu0 }
 0x4f7   : > { %v2467_v27 = vadd.f32 %v3946_v11, %v5292_v49 }
 0x4f8   : > { %v2458_v58 = vpop.f32.mrf.mxu0 }
 0x4f9   : > { %v2459_v2 = vadd.f32 %v5292_v49, %v2458_v58  ;;  %v2503_v62 = vmax.f32 %v2467_v27, 0.0 }
 0x4fa   : > { %v3947_v20 = vpop.f32.mrf.mxu0 }
 0x4fb   : > { %v2470_v32 = vadd.f32 %v3947_v20, %v5292_v49  ;;  %v2501_v30 = vmax.f32 %v2459_v2, 0.0 }
 0x4fc   : > { %v2461_v63 = vpop.f32.mrf.mxu0 }
 0x4fd   : > { %v2462_v61 = vadd.f32 %v5292_v49, %v2461_v63  ;;  %v2504_v14 = vmax.f32 %v2470_v32, 0.0 }
 0x4ff   : > { %v2502_v23 = vmax.f32 %v2462_v61, 0.0  ;;  %v2520_v47 = vpack.c.bf16 %v2504_v14, %v2503_v62 }
 0x501   : > { %v2519_v29 = vpack.c.bf16 %v2502_v23, %v2501_v30 }
 0x503   : > { %3992 = vmatprep.mubr.bf16.mxu1 %v2519_v29 }
 0x504   : > { %3993 = vmatmul.mubr.bf16.gmra.mxu1 %v2520_v47 }
 0x553   : > { %v3966_v31 = vpop.f32.mrf.mxu1 }
 0x554   : > { %v2635_v10 = vadd.f32 %v3966_v31, %v5326_v6 }
 0x555   : > { %v2626_v57 = vpop.f32.mrf.mxu1 }
 0x556   : > { %v3552_v4 = vmul.f32 -1.442695, %v2635_v10  ;;  %v2627_v41 = vadd.f32 %v5326_v6, %v2626_v57 }
 0x557   : > { %v3967_v56 = vpop.f32.mrf.mxu1 }
 0x558   : > { %4262 = vpow2.f32 %v3552_v4  ;;  %v3550_v49 = vmul.f32 -1.442695, %v2627_v41  ;;  %v2638_v53 = vadd.f32 %v3967_v56, %v5326_v6 }
 0x559   : > { %v2629_v50 = vpop.f32.mrf.mxu1 }
 0x55a   : > { %4264 = vpow2.f32 %v3550_v49  ;;  %v3553_v55 = vmul.f32 -1.442695, %v2638_v53  ;;  %v2630_v46 = vadd.f32 %v5326_v6, %v2629_v50 }
 0x55c   : > { %4266 = vpow2.f32 %v3553_v55  ;;  %v3551_v52 = vmul.f32 -1.442695, %v2630_v46 }
 0x55e   : > { %4268 = vpow2.f32 %v3551_v52 }
 0x564   : > { %v3970_v22 = vpop.f32.mrf.mxu1 }
 0x565   : > { %v4263_v8 = vpop.eup %4262  ;;  %v2651_v33 = vadd.f32 %v3970_v22, %v5326_v6 }
 0x566   : > { %v2851_v45 = vadd.f32 1.0, %v4263_v8  ;;  %v2642_v42 = vpop.f32.mrf.mxu1 }
 0x567   : > { %v4265_v1 = vpop.eup %4264  ;;  %v3556_v54 = vmul.f32 -1.442695, %v2651_v33  ;;  %v2643_v43 = vadd.f32 %v5326_v6, %v2642_v42 }
 0x568   : > { %4270 = vrcp.f32 %v2851_v45  ;;  %v2849_v39 = vadd.f32 1.0, %v4265_v1  ;;  %v3971_v5 = vpop.f32.mrf.mxu1 }
 0x569   : > { %v4267_v18 = vpop.eup %4266  ;;  %4272 = vpow2.f32 %v3556_v54  ;;  %v3554_v9 = vmul.f32 -1.442695, %v2643_v43  ;;  %v2654_v0 = vadd.f32 %v3971_v5, %v5326_v6 }
 0x56a   : > { %4274 = vrcp.f32 %v2849_v39  ;;  %v2852_v11 = vadd.f32 1.0, %v4267_v18  ;;  %v2645_v58 = vpop.f32.mrf.mxu1 }
 0x56b   : > { %v4269_v20 = vpop.eup %4268  ;;  %4276 = vpow2.f32 %v3554_v9  ;;  %v3557_v2 = vmul.f32 -1.442695, %v2654_v0  ;;  %v2646_v32 = vadd.f32 %v5326_v6, %v2645_v58 }
 0x56c   : > { %4278 = vrcp.f32 %v2852_v11  ;;  %v2850_v27 = vadd.f32 1.0, %v4269_v20 }
 0x56d   : > { %4280 = vpow2.f32 %v3557_v2  ;;  %v3555_v63 = vmul.f32 -1.442695, %v2646_v32 }
 0x56f   : > { %4282 = vpow2.f32 %v3555_v63 }
 0x570   : > { %4284 = vrcp.f32 %v2850_v27 }
 0x573   : > { %v3974_v61 = vpop.f32.mrf.mxu1 }
 0x574   : > { %v2667_v14 = vadd.f32 %v3974_v61, %v5326_v6 }
 0x575   : > { %v4271_v30 = vpop.eup %4270  ;;  %v2658_v23 = vpop.f32.mrf.mxu1 }
 0x576   : > { %v4273_v62 = vpop.eup %4272  ;;  %v3560_v29 = vmul.f32 -1.442695, %v2667_v14  ;;  %v2659_v47 = vadd.f32 %v5326_v6, %v2658_v23  ;;  %3109 = vrot.lane.b32.xlu0 %v4271_v30, %s4494_s29 }
 0x577   : > { %v4275_v31 = vpop.eup %4274  ;;  %v2855_v10 = vadd.f32 1.0, %v4273_v62  ;;  %v3975_v57 = vpop.f32.mrf.mxu1 }
 0x578   : > { %v4277_v4 = vpop.eup %4276  ;;  %4286 = vpow2.f32 %v3560_v29  ;;  %v3558_v41 = vmul.f32 -1.442695, %v2659_v47  ;;  %v2670_v56 = vadd.f32 %v3975_v57, %v5326_v6 }
 0x579   : > { %v4279_v49 = vpop.eup %4278  ;;  %4288 = vrcp.f32 %v2855_v10  ;;  %v2853_v53 = vadd.f32 1.0, %v4277_v4  ;;  %v2661_v50 = vpop.f32.mrf.mxu1 }
 0x57a   : > { %v4281_v55 = vpop.eup %4280  ;;  %4290 = vpow2.f32 %v3558_v41  ;;  %v3561_v46 = vmul.f32 -1.442695, %v2670_v56  ;;  %v2662_v52 = vadd.f32 %v5326_v6, %v2661_v50  ;;  %3111 = vrot.lane.b32.xlu1 %v4279_v49, %s4494_s29  ;;  %3105 = vrot.lane.b32.xlu0 %v4275_v31, %s4494_s29 }
 0x57b   : > { %4292 = vrcp.f32 %v2853_v53  ;;  %v2856_v22 = vadd.f32 1.0, %v4281_v55 }
 0x57c   : > { %v4283_v8 = vpop.eup %4282  ;;  %4294 = vpow2.f32 %v3561_v46  ;;  %v3559_v33 = vmul.f32 -1.442695, %v2662_v52 }
 0x57d   : > { %v4285_v45 = vpop.eup %4284  ;;  %4296 = vrcp.f32 %v2856_v22  ;;  %v2854_v42 = vadd.f32 1.0, %v4283_v8 }
 0x57e   : > { %4298 = vpow2.f32 %v3559_v33  ;;  %3107 = vrot.lane.b32.xlu1 %v4285_v45, %s4494_s29 }
 0x57f   : > { %4300 = vrcp.f32 %v2854_v42 }
 0x584   : > { %v3978_v1 = vpop.f32.mrf.mxu1 }
 0x585   : > { %v4287_v54 = vpop.eup %4286  ;;  %v2683_v43 = vadd.f32 %v3978_v1, %v5326_v6 }
 0x586   : > { %v4289_v39 = vpop.eup %4288  ;;  %v2859_v5 = vadd.f32 1.0, %v4287_v54  ;;  %v2674_v18 = vpop.f32.mrf.mxu1 }
 0x587   : > { %v4291_v9 = vpop.eup %4290  ;;  %v3564_v0 = vmul.f32 -1.442695, %v2683_v43  ;;  %v2675_v11 = vadd.f32 %v5326_v6, %v2674_v18  ;;  %3117 = vrot.lane.b32.xlu0 %v4289_v39, %s4494_s29 }
 0x588   : > { %v4293_v58 = vpop.eup %4292  ;;  %4302 = vrcp.f32 %v2859_v5  ;;  %v2857_v20 = vadd.f32 1.0, %v4291_v9  ;;  %v3979_v2 = vpop.f32.mrf.mxu1 }
 0x589   : > { %v4295_v32 = vpop.eup %4294  ;;  %4304 = vpow2.f32 %v3564_v0  ;;  %v3562_v27 = vmul.f32 -1.442695, %v2675_v11  ;;  %v2686_v63 = vadd.f32 %v3979_v2, %v5326_v6 }
 0x58a   : > { %v4297_v61 = vpop.eup %4296  ;;  %4306 = vrcp.f32 %v2857_v20  ;;  %v2860_v14 = vadd.f32 1.0, %v4295_v32  ;;  %v2677_v30 = vpop.f32.mrf.mxu1 }
 0x58b   : > { %v4299_v23 = vpop.eup %4298  ;;  %4308 = vpow2.f32 %v3562_v27  ;;  %v3565_v62 = vmul.f32 -1.442695, %v2686_v63  ;;  %v2678_v29 = vadd.f32 %v5326_v6, %v2677_v30  ;;  %3119 = vrot.lane.b32.xlu1 %v4297_v61, %s4494_s29  ;;  %3113 = vrot.lane.b32.xlu0 %v4293_v58, %s4494_s29 }
 0x58c   : > { %4310 = vrcp.f32 %v2860_v14  ;;  %v2858_v47 = vadd.f32 1.0, %v4299_v23  ;;  %v4301_v10 = vpop.eup %4300 }
 0x58d   : > { %4312 = vpow2.f32 %v3565_v62  ;;  %v3563_v31 = vmul.f32 -1.442695, %v2678_v29 }
 0x58f   : > { %4314 = vpow2.f32 %v3563_v31  ;;  %3115 = vrot.lane.b32.xlu1 %v4301_v10, %s4494_s29 }
 0x590   : > { %4316 = vrcp.f32 %v2858_v47 }
 0x593   : > { %v3982_v57 = vpop.f32.mrf.mxu1 }
 0x594   : > { %v2699_v4 = vadd.f32 %v3982_v57, %v5326_v6 }
 0x595   : > { %v4303_v41 = vpop.eup %4302  ;;  %v2690_v56 = vpop.f32.mrf.mxu1 }
 0x596   : > { %v4305_v49 = vpop.eup %4304  ;;  %v3568_v53 = vmul.f32 -1.442695, %v2699_v4  ;;  %v2691_v50 = vadd.f32 %v5326_v6, %v2690_v56  ;;  %3125 = vrot.lane.b32.xlu0 %v4303_v41, %s4494_s29 }
 0x597   : > { %v4307_v55 = vpop.eup %4306  ;;  %v2863_v46 = vadd.f32 1.0, %v4305_v49  ;;  %v3983_v52 = vpop.f32.mrf.mxu1 }
 0x598   : > { %v4309_v22 = vpop.eup %4308  ;;  %4318 = vpow2.f32 %v3568_v53  ;;  %v3566_v8 = vmul.f32 -1.442695, %v2691_v50  ;;  %v2702_v33 = vadd.f32 %v3983_v52, %v5326_v6 }
 0x599   : > { %v4311_v45 = vpop.eup %4310  ;;  %4320 = vrcp.f32 %v2863_v46  ;;  %v2861_v42 = vadd.f32 1.0, %v4309_v22  ;;  %v2693_v1 = vpop.f32.mrf.mxu1 }
 0x59a   : > { %v4313_v54 = vpop.eup %4312  ;;  %4322 = vpow2.f32 %v3566_v8  ;;  %v3569_v43 = vmul.f32 -1.442695, %v2702_v33  ;;  %v2694_v39 = vadd.f32 %v5326_v6, %v2693_v1  ;;  %3127 = vrot.lane.b32.xlu1 %v4311_v45, %s4494_s29  ;;  %3121 = vrot.lane.b32.xlu0 %v4307_v55, %s4494_s29 }
 0x59b   : > { %4324 = vrcp.f32 %v2861_v42  ;;  %v2864_v5 = vadd.f32 1.0, %v4313_v54 }
 0x59c   : > { %v4315_v18 = vpop.eup %4314  ;;  %4326 = vpow2.f32 %v3569_v43  ;;  %v3567_v9 = vmul.f32 -1.442695, %v2694_v39 }
 0x59d   : > { %v4317_v0 = vpop.eup %4316  ;;  %4328 = vrcp.f32 %v2864_v5  ;;  %v2862_v11 = vadd.f32 1.0, %v4315_v18 }
 0x59e   : > { %4330 = vpow2.f32 %v3567_v9  ;;  %3123 = vrot.lane.b32.xlu1 %v4317_v0, %s4494_s29 }
 0x59f   : > { %4332 = vrcp.f32 %v2862_v11 }
 0x5a4   : > { %v3986_v58 = vpop.f32.mrf.mxu1 }
 0x5a5   : > { %v4319_v20 = vpop.eup %4318  ;;  %v2715_v2 = vadd.f32 %v3986_v58, %v5326_v6 }
 0x5a6   : > { %v4321_v32 = vpop.eup %4320  ;;  %v2867_v27 = vadd.f32 1.0, %v4319_v20  ;;  %v2706_v63 = vpop.f32.mrf.mxu1 }
 0x5a7   : > { %v4323_v61 = vpop.eup %4322  ;;  %v3572_v14 = vmul.f32 -1.442695, %v2715_v2  ;;  %v2707_v30 = vadd.f32 %v5326_v6, %v2706_v63  ;;  %3133 = vrot.lane.b32.xlu0 %v4321_v32, %s4494_s29 }
 0x5a8   : > { %v4325_v23 = vpop.eup %4324  ;;  %4334 = vrcp.f32 %v2867_v27  ;;  %v2865_v62 = vadd.f32 1.0, %v4323_v61  ;;  %v3987_v29 = vpop.f32.mrf.mxu1 }
 0x5a9   : > { %v4327_v47 = vpop.eup %4326  ;;  %4336 = vpow2.f32 %v3572_v14  ;;  %v3570_v31 = vmul.f32 -1.442695, %v2707_v30  ;;  %v2718_v10 = vadd.f32 %v3987_v29, %v5326_v6 }
 0x5aa   : > { %v4329_v57 = vpop.eup %4328  ;;  %4338 = vrcp.f32 %v2865_v62  ;;  %v2868_v4 = vadd.f32 1.0, %v4327_v47  ;;  %v2709_v41 = vpop.f32.mrf.mxu1 }
 0x5ab   : > { %v4331_v56 = vpop.eup %4330  ;;  %4340 = vpow2.f32 %v3570_v31  ;;  %v3573_v49 = vmul.f32 -1.442695, %v2718_v10  ;;  %v2710_v53 = vadd.f32 %v5326_v6, %v2709_v41  ;;  %3135 = vrot.lane.b32.xlu1 %v4329_v57, %s4494_s29  ;;  %3129 = vrot.lane.b32.xlu0 %v4325_v23, %s4494_s29 }
 0x5ac   : > { %4342 = vrcp.f32 %v2868_v4  ;;  %v2866_v50 = vadd.f32 1.0, %v4331_v56  ;;  %v4333_v46 = vpop.eup %4332 }
 0x5ad   : > { %4344 = vpow2.f32 %v3573_v49  ;;  %v3571_v55 = vmul.f32 -1.442695, %v2710_v53 }
 0x5af   : > { %4346 = vpow2.f32 %v3571_v55  ;;  %3131 = vrot.lane.b32.xlu1 %v4333_v46, %s4494_s29 }
 0x5b0   : > { %4348 = vrcp.f32 %v2866_v50 }
 0x5b3   : > { %v3990_v52 = vpop.f32.mrf.mxu1 }
 0x5b4   : > { %v2731_v22 = vadd.f32 %v3990_v52, %v5326_v6 }
 0x5b5   : > { %v4335_v8 = vpop.eup %4334  ;;  %v2722_v33 = vpop.f32.mrf.mxu1 }
 0x5b6   : > { %v4337_v45 = vpop.eup %4336  ;;  %v3576_v42 = vmul.f32 -1.442695, %v2731_v22  ;;  %v2723_v1 = vadd.f32 %v5326_v6, %v2722_v33  ;;  %3141 = vrot.lane.b32.xlu0 %v4335_v8, %s4494_s29 }
 0x5b7   : > { %v4339_v54 = vpop.eup %4338  ;;  %v2871_v43 = vadd.f32 1.0, %v4337_v45  ;;  %v3991_v39 = vpop.f32.mrf.mxu1 }
 0x5b8   : > { %v4341_v5 = vpop.eup %4340  ;;  %4350 = vpow2.f32 %v3576_v42  ;;  %v3574_v18 = vmul.f32 -1.442695, %v2723_v1  ;;  %v2734_v9 = vadd.f32 %v3991_v39, %v5326_v6 }
 0x5b9   : > { %v4343_v0 = vpop.eup %4342  ;;  %4352 = vrcp.f32 %v2871_v43  ;;  %v2869_v11 = vadd.f32 1.0, %v4341_v5  ;;  %v2725_v58 = vpop.f32.mrf.mxu1 }
 0x5ba   : > { %v4345_v20 = vpop.eup %4344  ;;  %4354 = vpow2.f32 %v3574_v18  ;;  %v3577_v2 = vmul.f32 -1.442695, %v2734_v9  ;;  %v2726_v32 = vadd.f32 %v5326_v6, %v2725_v58  ;;  %3143 = vrot.lane.b32.xlu1 %v4343_v0, %s4494_s29  ;;  %3137 = vrot.lane.b32.xlu0 %v4339_v54, %s4494_s29 }
 0x5bb   : > { %4356 = vrcp.f32 %v2869_v11  ;;  %v2872_v27 = vadd.f32 1.0, %v4345_v20 }
 0x5bc   : > { %v4347_v63 = vpop.eup %4346  ;;  %4358 = vpow2.f32 %v3577_v2  ;;  %v3575_v61 = vmul.f32 -1.442695, %v2726_v32 }
 0x5bd   : > { %v4349_v14 = vpop.eup %4348  ;;  %4360 = vrcp.f32 %v2872_v27  ;;  %v2870_v30 = vadd.f32 1.0, %v4347_v63  ;;  %v5390_v63 = vpop.permute.xlu0 %3033 }
 0x5be   : > { %4362 = vpow2.f32 %v3575_v61  ;;  %3139 = vrot.lane.b32.xlu1 %v4349_v14, %s4494_s29  ;;  %v5395_v61 = vld [vmem:[%s5612_s8] ss:$0 sm:$0xff]  ;;  %v5670_v14 = vld [vmem:[#allocation10_spill] sm:$0xff] }
 0x5bf   : > { %4364 = vrcp.f32 %v2870_v30  ;;  %v1147_v30 = vadd.f32 %v5395_v61, %v5670_v14 }
 0x5c4   : > { %v3994_v23 = vpop.f32.mrf.mxu1 }
 0x5c5   : > { %v4351_v62 = vpop.eup %4350  ;;  %v2747_v29 = vadd.f32 %v3994_v23, %v5326_v6 }
 0x5c6   : > { %v4353_v47 = vpop.eup %4352  ;;  %v2875_v31 = vadd.f32 1.0, %v4351_v62  ;;  %v2738_v10 = vpop.f32.mrf.mxu1  ;;  %v3204_v62 = vsel %vm3201_vm2, %v1147_v30, %v5092_v24 }
 0x5c7   : > { %v4355_v57 = vpop.eup %4354  ;;  %v3580_v4 = vmul.f32 -1.442695, %v2747_v29  ;;  %v2739_v41 = vadd.f32 %v5326_v6, %v2738_v10  ;;  %3149 = vrot.lane.b32.xlu0 %v4353_v47, %s4494_s29  ;;  %v5401_v29 = vpop.permute.xlu1 %3035  ;;  %v5672_v10 = vld [vmem:[#allocation11_spill] sm:$0xff] }
 0x5c8   : > { %v4357_v56 = vpop.eup %4356  ;;  %4366 = vrcp.f32 %v2875_v31  ;;  %v2873_v49 = vadd.f32 1.0, %v4355_v57  ;;  %v3995_v53 = vpop.f32.mrf.mxu1  ;;  %v1148_v57 = vadd.f32 %v5395_v61, %v5672_v10 }
 0x5c9   : > { %v4359_v50 = vpop.eup %4358  ;;  %4368 = vpow2.f32 %v3580_v4  ;;  %v3578_v55 = vmul.f32 -1.442695, %v2739_v41  ;;  %v2750_v46 = vadd.f32 %v3995_v53, %v5326_v6 }
 0x5ca   : > { %v4361_v52 = vpop.eup %4360  ;;  %4370 = vrcp.f32 %v2873_v49  ;;  %v2876_v22 = vadd.f32 1.0, %v4359_v50  ;;  %v2741_v8 = vpop.f32.mrf.mxu1 }
 0x5cb   : > { %v4363_v33 = vpop.eup %4362  ;;  %4372 = vpow2.f32 %v3578_v55  ;;  %v3581_v45 = vmul.f32 -1.442695, %v2750_v46  ;;  %v2742_v42 = vadd.f32 %v5326_v6, %v2741_v8  ;;  %3151 = vrot.lane.b32.xlu1 %v4361_v52, %s4494_s29  ;;  %3145 = vrot.lane.b32.xlu0 %v4357_v56, %s4494_s29  ;;  %v3205_v56 = vsel %vm3201_vm2, %v1148_v57, %v5097_v13  ;;  %v5673_v46 = vld [vmem:[#allocation12_spill] sm:$0xff] }
 0x5cc   : > { %4374 = vrcp.f32 %v2876_v22  ;;  %v2874_v1 = vadd.f32 1.0, %v4363_v33  ;;  %v4365_v43 = vpop.eup %4364  ;;  %v1146_v52 = vadd.f32 %v5395_v61, %v5673_v46 }
 0x5cd   : > { %v3579_v54 = vmul.f32 -1.442695, %v2742_v42  ;;  %4376 = vpow2.f32 %v3581_v45 }
 0x5cf   : > { %4378 = vpow2.f32 %v3579_v54  ;;  %3147 = vrot.lane.b32.xlu1 %v4365_v43, %s4494_s29 }
 0x5d0   : > { %4380 = vrcp.f32 %v2874_v1 }
 0x5d5   : > { %v4367_v39 = vpop.eup %4366 }
 0x5d6   : > { %v4369_v5 = vpop.eup %4368  ;;  %3157 = vrot.lane.b32.xlu0 %v4367_v39, %s4494_s29 }
 0x5d7   : > { %v4371_v18 = vpop.eup %4370  ;;  %v2879_v11 = vadd.f32 1.0, %v4369_v5 }
 0x5d8   : > { %v4373_v6 = vpop.eup %4372 }
 0x5d9   : > { %v4375_v9 = vpop.eup %4374  ;;  %v2877_v0 = vadd.f32 1.0, %v4373_v6  ;;  %v5674_v6 = vld [vmem:[#allocation13_spill] sm:$0xff] }
 0x5da   : > { %3159 = vrot.lane.b32.xlu1 %v4375_v9, %s4494_s29  ;;  %3153 = vrot.lane.b32.xlu0 %v4371_v18, %s4494_s29  ;;  %v4377_v58 = vpop.eup %4376  ;;  %v1150_v9 = vadd.f32 %v5395_v61, %v5674_v6 }
 0x5db   : > { %4382 = vrcp.f32 %v2877_v0  ;;  %v2880_v27 = vadd.f32 1.0, %v4377_v58 }
 0x5dc   : > { %v4379_v20 = vpop.eup %4378  ;;  %4384 = vrcp.f32 %v2879_v11  ;;  %v3207_v11 = vsel %vm3201_vm2, %v1150_v9, %v5111_v16 }
 0x5dd   : > { %v4381_v2 = vpop.eup %4380  ;;  %v2878_v32 = vadd.f32 1.0, %v4379_v20 }
 0x5de   : > { %3155 = vrot.lane.b32.xlu1 %v4381_v2, %s4494_s29 }
 0x5df   : > { %4386 = vrcp.f32 %v2878_v32 }
 0x5e0   : > { %4388 = vrcp.f32 %v2880_v27 }
 0x5e8   : > { %v4383_v23 = vpop.eup %4382  ;;  %v3110_v47 = vpop.permute.xlu0 %3109 }
 0x5e9   : > { %v3237_v31 = vsel %vm3234_vm3, %v3204_v62, %v3110_v47  ;;  %3161 = vrot.lane.b32.xlu0 %v4383_v23, %s4494_s29  ;;  %v4385_v4 = vpop.eup %4384  ;;  %v5675_v23 = vld [vmem:[#allocation14_spill] sm:$0xff] }
 0x5ea   : > { %v3270_v24 = vsel %vm3267_vm4, %v3237_v31, 0.0  ;;  %v1154_v62 = vadd.f32 %v5395_v61, %v5675_v23 }
 0x5eb   : > { %3303 = vst.msk [vmem:[%s5406_s27 + $0x10] sm:$0xff] %vm3300_vm5, %v3270_v24 }
 0x5ec   : > { %v4387_v41 = vpop.eup %4386  ;;  %v3112_v49 = vpop.permute.xlu1 %3111  ;;  %v3211_v31 = vsel %vm3201_vm2, %v1154_v62, %v5125_v17 }
 0x5ed   : > { %v3106_v53 = vpop.permute.xlu0 %3105  ;;  %v3238_v50 = vsel %vm3234_vm3, %v3205_v56, %v3112_v49  ;;  %3163 = vrot.lane.b32.xlu1 %v4387_v41, %s4494_s29  ;;  %3165 = vrot.lane.b32.xlu0 %v4385_v4, %s4494_s29  ;;  %v4389_v8 = vpop.eup %4388 }
 0x5ee   : > { %v3235_v55 = vsel %vm3234_vm3, %v5087_v48, %v3106_v53  ;;  %v3271_v22 = vsel %vm3267_vm4, %v3238_v50, 0.0  ;;  %v3203_v48 = vsel %vm3201_vm2, %v1146_v52, %v5094_v44  ;;  %v5676_v53 = vld [vmem:[#allocation15_spill] sm:$0xff] }
 0x5ef   : > { %v3268_v13 = vsel %vm3267_vm4, %v3235_v55, 0.0  ;;  %3304 = vst.msk [vmem:[%s5406_s27 + $0x18] sm:$0xff] %vm3300_vm5, %v3271_v22  ;;  %v1158_v50 = vadd.f32 %v5395_v61, %v5676_v53 }
 0x5f0   : > { %3301 = vst.msk [vmem:[%s5406_s27] sm:$0xff] %vm3300_vm5, %v3268_v13  ;;  %v3108_v33 = vpop.permute.xlu1 %3107 }
 0x5f1   : > { %v3236_v45 = vsel %vm3234_vm3, %v3203_v48, %v3108_v33  ;;  %3167 = vrot.lane.b32.xlu1 %v4389_v8, %s4494_s29  ;;  %v3215_v46 = vsel %vm3201_vm2, %v1158_v50, %v5138_v37 }
 0x5f2   : > { %v3269_v42 = vsel %vm3267_vm4, %v3236_v45, 0.0  ;;  %v5677_v45 = vld [vmem:[#allocation29_spill] sm:$0xff] }
 0x5f3   : > { %3302 = vst.msk [vmem:[%s5406_s27 + $0x8] sm:$0xff] %vm3300_vm5, %v3269_v42 }
 0x5f9   : > { %v3118_v1 = vpop.permute.xlu0 %3117 }
 0x5fa   : > { %v3241_v54 = vsel %vm3234_vm3, %v5100_v25, %v3118_v1 }
 0x5fb   : > { %v3274_v43 = vsel %vm3267_vm4, %v3241_v54, 0.0 }
 0x5fc   : > { %3307 = vst.msk [vmem:[%s5406_s27 + $0x30] sm:$0xff] %vm3300_vm5, %v3274_v43  ;;  %v5678_v43 = vld [vmem:[#allocation30_spill] sm:$0xff] }
 0x5fd   : > { %v3120_v44 = vpop.permute.xlu1 %3119  ;;  %v3114_v39 = vpop.permute.xlu0 %3113 }
 0x5fe   : > { %v3242_v5 = vsel %vm3234_vm3, %v5105_v59, %v3120_v44  ;;  %v3239_v18 = vsel %vm3234_vm3, %v5108_v38, %v3114_v39 }
 0x5ff   : > { %v3275_v0 = vsel %vm3267_vm4, %v3242_v5, 0.0  ;;  %v3272_v25 = vsel %vm3267_vm4, %v3239_v18, 0.0  ;;  %v5679_v5 = vld [vmem:[#allocation31_spill] sm:$0xff] }
 0x600   : > { %3308 = vst.msk [vmem:[%s5406_s27 + $0x38] sm:$0xff] %vm3300_vm5, %v3275_v0  ;;  %3305 = vst.msk [vmem:[%s5406_s27 + $0x20] sm:$0xff] %vm3300_vm5, %v3272_v25  ;;  %v5680_v25 = vld [vmem:[#allocation32_spill] sm:$0xff] }
 0x601   : > { %v3116_v58 = vpop.permute.xlu1 %3115 }
 0x602   : > { %v3240_v59 = vsel %vm3234_vm3, %v3207_v11, %v3116_v58  ;;  %v5681_v58 = vld [vmem:[#allocation33_spill] sm:$0xff] }
 0x603   : > { %v3273_v38 = vsel %vm3267_vm4, %v3240_v59, 0.0 }
 0x604   : > { %3306 = vst.msk [vmem:[%s5406_s27 + $0x28] sm:$0xff] %vm3300_vm5, %v3273_v38 }
 0x608   : > { %v3126_v20 = vpop.permute.xlu0 %3125 }
 0x609   : > { %v3245_v2 = vsel %vm3234_vm3, %v5114_v51, %v3126_v20 }
 0x60a   : > { %v3278_v32 = vsel %vm3267_vm4, %v3245_v2, 0.0 }
 0x60b   : > { %3311 = vst.msk [vmem:[%s5406_s27 + $0x50] sm:$0xff] %vm3300_vm5, %v3278_v32  ;;  %v5682_v32 = vld [vmem:[#allocation34_spill] sm:$0xff] }
 0x60c   : > { %v3128_v27 = vpop.permute.xlu1 %3127  ;;  %v3122_v16 = vpop.permute.xlu0 %3121 }
 0x60d   : > { %v3246_v14 = vsel %vm3234_vm3, %v5119_v60, %v3128_v27  ;;  %v3243_v30 = vsel %vm3234_vm3, %v5122_v21, %v3122_v16 }
 0x60e   : > { %v3279_v47 = vsel %vm3267_vm4, %v3246_v14, 0.0  ;;  %v3276_v51 = vsel %vm3267_vm4, %v3243_v30, 0.0 }
 0x60f   : > { %3312 = vst.msk [vmem:[%s5406_s27 + $0x58] sm:$0xff] %vm3300_vm5, %v3279_v47  ;;  %3309 = vst.msk [vmem:[%s5406_s27 + $0x40] sm:$0xff] %vm3300_vm5, %v3276_v51 }
 0x610   : > { %v3124_v10 = vpop.permute.xlu1 %3123 }
 0x611   : > { %v3244_v60 = vsel %vm3234_vm3, %v3211_v31, %v3124_v10 }
 0x612   : > { %v3277_v21 = vsel %vm3267_vm4, %v3244_v60, 0.0 }
 0x613   : > { %3310 = vst.msk [vmem:[%s5406_s27 + $0x48] sm:$0xff] %vm3300_vm5, %v3277_v21 }
 0x619   : > { %v3134_v57 = vpop.permute.xlu0 %3133 }
 0x61a   : > { %v3249_v24 = vsel %vm3234_vm3, %v5128_v12, %v3134_v57 }
 0x61b   : > { %v3282_v4 = vsel %vm3267_vm4, %v3249_v24, 0.0 }
 0x61c   : > { %3315 = vst.msk [vmem:[%s5406_s27 + $0x70] sm:$0xff] %vm3300_vm5, %v3282_v4 }
 0x61d   : > { %v3136_v41 = vpop.permute.xlu1 %3135  ;;  %v3130_v17 = vpop.permute.xlu0 %3129 }
 0x61e   : > { %v3250_v56 = vsel %vm3234_vm3, %v5133_v34, %v3136_v41  ;;  %v3247_v49 = vsel %vm3234_vm3, %v5136_v35, %v3130_v17  ;;  %v5684_v41 = vld [vmem:[#allocation27_spill] sm:$0xff] }
 0x61f   : > { %v3283_v55 = vsel %vm3267_vm4, %v3250_v56, 0.0  ;;  %v3280_v12 = vsel %vm3267_vm4, %v3247_v49, 0.0  ;;  %v1174_v17 = vadd.f32 %v5395_v61, %v5684_v41 }
 0x620   : > { %3316 = vst.msk [vmem:[%s5406_s27 + $0x78] sm:$0xff] %vm3300_vm5, %v3283_v55  ;;  %3313 = vst.msk [vmem:[%s5406_s27 + $0x60] sm:$0xff] %vm3300_vm5, %v3280_v12 }
 0x621   : > { %v3132_v34 = vpop.permute.xlu1 %3131 }
 0x622   : > { %v3248_v52 = vsel %vm3234_vm3, %v3215_v46, %v3132_v34 }
 0x623   : > { %v3281_v35 = vsel %vm3267_vm4, %v3248_v52, 0.0 }
 0x624   : > { %3314 = vst.msk [vmem:[%s5406_s27 + $0x68] sm:$0xff] %vm3300_vm5, %v3281_v35 }
 0x628   : > { %v3142_v22 = vpop.permute.xlu0 %3141 }
 0x629   : > { %v3253_v13 = vsel %vm3234_vm3, %v5142_v40, %v3142_v22 }
 0x62a   : > { %v3286_v8 = vsel %vm3267_vm4, %v3253_v13, 0.0 }
 0x62b   : > { %3319 = vst.msk [vmem:[%s5406_s27 + $0x90] sm:$0xff] %vm3300_vm5, %v3286_v8 }
 0x62c   : > { %v3144_v48 = vpop.permute.xlu1 %3143  ;;  %v3138_v37 = vpop.permute.xlu0 %3137 }
 0x62d   : > { %v3254_v33 = vsel %vm3234_vm3, %v5146_v3, %v3144_v48  ;;  %v3251_v42 = vsel %vm3234_vm3, %v5677_v45, %v3138_v37 }
 0x62e   : > { %v3287_v1 = vsel %vm3267_vm4, %v3254_v33, 0.0  ;;  %v3284_v54 = vsel %vm3267_vm4, %v3251_v42, 0.0 }
 0x62f   : > { %3320 = vst.msk [vmem:[%s5406_s27 + $0x98] sm:$0xff] %vm3300_vm5, %v3287_v1  ;;  %3317 = vst.msk [vmem:[%s5406_s27 + $0x80] sm:$0xff] %vm3300_vm5, %v3284_v54 }
 0x630   : > { %v3140_v40 = vpop.permute.xlu1 %3139 }
 0x631   : > { %v3252_v44 = vsel %vm3234_vm3, %v5678_v43, %v3140_v40 }
 0x632   : > { %v3285_v39 = vsel %vm3267_vm4, %v3252_v44, 0.0 }
 0x633   : > { %3318 = vst.msk [vmem:[%s5406_s27 + $0x88] sm:$0xff] %vm3300_vm5, %v3285_v39 }
 0x639   : > { %v3150_v3 = vpop.permute.xlu0 %3149 }
 0x63a   : > { %v3257_v18 = vsel %vm3234_vm3, %v5679_v5, %v3150_v3 }
 0x63b   : > { %v3290_v6 = vsel %vm3267_vm4, %v3257_v18, 0.0 }
 0x63c   : > { %3323 = vst.msk [vmem:[%s5406_s27 + $0xb0] sm:$0xff] %vm3300_vm5, %v3290_v6 }
 0x63d   : > { %v3152_v9 = vpop.permute.xlu1 %3151  ;;  %v3146_v0 = vpop.permute.xlu0 %3145 }
 0x63e   : > { %v3258_v11 = vsel %vm3234_vm3, %v5680_v25, %v3152_v9  ;;  %v3255_v59 = vsel %vm3234_vm3, %v5681_v58, %v3146_v0 }
 0x63f   : > { %v3291_v38 = vsel %vm3267_vm4, %v3258_v11, 0.0  ;;  %v3288_v20 = vsel %vm3267_vm4, %v3255_v59, 0.0 }
 0x640   : > { %3324 = vst.msk [vmem:[%s5406_s27 + $0xb8] sm:$0xff] %vm3300_vm5, %v3291_v38  ;;  %3321 = vst.msk [vmem:[%s5406_s27 + $0xa0] sm:$0xff] %vm3300_vm5, %v3288_v20 }
 0x641   : > { %v3148_v2 = vpop.permute.xlu1 %3147 }
 0x642   : > { %v3256_v27 = vsel %vm3234_vm3, %v5682_v32, %v3148_v2 }
 0x643   : > { %v3289_v16 = vsel %vm3267_vm4, %v3256_v27, 0.0 }
 0x644   : > { %3322 = vst.msk [vmem:[%s5406_s27 + $0xa8] sm:$0xff] %vm3300_vm5, %v3289_v16 }
 0x648   : > { %v3158_v14 = vpop.permute.xlu0 %3157 }
 0x649   : > { %v3261_v30 = vsel %vm3234_vm3, %v5199_v7, %v3158_v14 }
 0x64a   : > { %v3294_v23 = vsel %vm3267_vm4, %v3261_v30, 0.0 }
 0x64b   : > { %3327 = vst.msk [vmem:[%s5406_s27 + $0xd0] sm:$0xff] %vm3300_vm5, %v3294_v23 }
 0x64c   : > { %v3160_v62 = vpop.permute.xlu1 %3159  ;;  %v3154_v47 = vpop.permute.xlu0 %3153 }
 0x64d   : > { %v3262_v51 = vsel %vm3234_vm3, %v5206_v36, %v3160_v62  ;;  %v3259_v31 = vsel %vm3234_vm3, %v5210_v28, %v3154_v47  ;;  %v5683_v36 = vld [vmem:[#allocation17_spill] sm:$0xff] }
 0x64e   : > { %v3295_v10 = vsel %vm3267_vm4, %v3262_v51, 0.0  ;;  %v3292_v60 = vsel %vm3267_vm4, %v3259_v31, 0.0  ;;  %v3230_v28 = vsel %vm3201_vm2, %v5683_v36, %v5390_v63 }
 0x64f   : > { %3328 = vst.msk [vmem:[%s5406_s27 + $0xd8] sm:$0xff] %vm3300_vm5, %v3295_v10  ;;  %3325 = vst.msk [vmem:[%s5406_s27 + $0xc0] sm:$0xff] %vm3300_vm5, %v3292_v60 }
 0x650   : > { %v3156_v7 = vpop.permute.xlu1 %3155 }
 0x651   : > { %v3260_v21 = vsel %vm3234_vm3, %v5214_v19, %v3156_v7  ;;  %v3231_v19 = vsel %vm3201_vm2, %v1174_v17, %v5401_v29 }
 0x652   : > { %v3293_v57 = vsel %vm3267_vm4, %v3260_v21, 0.0 }
 0x653   : > { %3326 = vst.msk [vmem:[%s5406_s27 + $0xc8] sm:$0xff] %vm3300_vm5, %v3293_v57 }
 0x65b   : > { %v3162_v24 = vpop.permute.xlu0 %3161 }
 0x65c   : > { %v3263_v4 = vsel %vm3234_vm3, %v3230_v28, %v3162_v24 }
 0x65d   : > { %v3296_v56 = vsel %vm3267_vm4, %v3263_v4, 0.0 }
 0x65e   : > { %3329 = vst.msk [vmem:[%s5406_s27 + $0xe0] sm:$0xff] %vm3300_vm5, %v3296_v56 }
 0x65f   : > { %v3164_v49 = vpop.permute.xlu1 %3163  ;;  %v3166_v53 = vpop.permute.xlu0 %3165 }
 0x660   : > { %v3264_v50 = vsel %vm3234_vm3, %v3231_v19, %v3164_v49  ;;  %v3265_v63 = vsel %vm3234_vm3, %v5226_v26, %v3166_v53 }
 0x661   : > { %v3297_v55 = vsel %vm3267_vm4, %v3264_v50, 0.0  ;;  %v3298_v12 = vsel %vm3267_vm4, %v3265_v63, 0.0 }
 0x662   : > { %3330 = vst.msk [vmem:[%s5406_s27 + $0xe8] sm:$0xff] %vm3300_vm5, %v3297_v55  ;;  %3331 = vst.msk [vmem:[%s5406_s27 + $0xf0] sm:$0xff] %vm3300_vm5, %v3298_v12 }
 0x663   : > { %v3168_v61 = vpop.permute.xlu1 %3167 }
 0x664   : > { %v3266_v46 = vsel %vm3234_vm3, %v5230_v15, %v3168_v61 }
 0x665   : > { %v3299_v29 = vsel %vm3267_vm4, %v3266_v46, 0.0 }
 0x666   : > { %3332 = vst.msk [vmem:[%s5406_s27 + $0xf8] sm:$0xff] %vm3300_vm5, %v3299_v29 }
 0x667 PF: > { %s5685_s22 = sld [smem:[#allocation9_spill]]  ;;  %s5686_s19 = smov %s4476_s20 }
 0x668   : > { %s5687_s20 = smov %s4480_s21  ;;  %s5688_s21 = smov %s4622_s18 }
 0x66d   : > { %p24_p7 = scmp.ge.s32.totalorder %s5685_s22, 4  }
 0x66f   :  { %26 = sbr.rel (!%p24_p7) target bundleno = 7 (0x7), region = 108 }
 0x674   :  { %3355 = vsyncpa [#allocation4], 1 }
 0x675   :  { %3357 = vsyncpa [#allocation4 + $0x1], 1 }
 0x676   :  { %3358 = vsyncpa [#allocation6], 1 }

</bundles_post_ra>
